<compile_context>
chip_gen: v7x
topology: tpu7x:2x2x1
jax: 0.10.0
libtpu: 0.0.40
codegen_flags: <defaults>
</compile_context>

<pallas_src>
import functools

import jax
import jax.numpy as jnp
from jax.experimental import pallas as pl
from jax.experimental.pallas import tpu as pltpu

EPS = 1e-5  # PyTorch BatchNorm2d default


# ----------------------------------------------------------------------------
# Pallas kernels
# ----------------------------------------------------------------------------
def _pw_bias_relu_kernel(x_ref, w_ref, b_ref, o_ref):
    """1x1 conv as matmul (bf16 x bf16 -> f32 acc), folded-BN bias, ReLU."""
    y = jnp.dot(x_ref[...], w_ref[...], preferred_element_type=jnp.float32)
    y = jnp.maximum(y + b_ref[...], 0.0)
    o_ref[...] = y.astype(o_ref.dtype)


def _fused_tail_kernel(t_ref, xs_ref, wg_ref, b2_ref, w3_ref, b3_ref,
                       wsc_ref, bsc_ref, o_ref):
    """Fused tail:
         grouped 3x3 conv as ONE (tm, 9C)x(9C, C) matmul + BN2 bias + ReLU
         -> conv3 (1x1) + BN3 bias
         -> + shortcut (1x1 conv + BN bias)
         -> final ReLU."""
    h = jnp.dot(t_ref[...], wg_ref[...], preferred_element_type=jnp.float32)
    h = jnp.maximum(h + b2_ref[...], 0.0).astype(wg_ref.dtype)       # bf16 for next MXU op
    y = jnp.dot(h, w3_ref[...], preferred_element_type=jnp.float32) + b3_ref[...]
    r = jnp.dot(xs_ref[...], wsc_ref[...], preferred_element_type=jnp.float32) + bsc_ref[...]
    o_ref[...] = jnp.maximum(y + r, 0.0).astype(o_ref.dtype)


# ----------------------------------------------------------------------------
# tiling helpers (no divisibility asserts; partial tiles handled by padding)
# ----------------------------------------------------------------------------
def _round_up(x, m):
    return (x + m - 1) // m * m


def _tile_rows(m, cap):
    """Largest row tile <= cap, multiple of 8, giving >=2 grid steps when m allows."""
    tm = max(8, min(cap, _round_up(pl.cdiv(m, 2), 8)))
    return tm, _round_up(m, tm)


def _pad_rows(a, mp):
    m = a.shape[0]
    return a if m == mp else jnp.pad(a, ((0, mp - m), (0, 0)))


# ----------------------------------------------------------------------------
# pallas_call wrappers
# ----------------------------------------------------------------------------
def pointwise_bias_relu(x, w, b, *, cap=1024):
    m, cin = x.shape
    cout = w.shape[1]
    tm, mp = _tile_rows(m, cap)
    out = pl.pallas_call(
        _pw_bias_relu_kernel,
        out_shape=jax.ShapeDtypeStruct((mp, cout), jnp.bfloat16),
        grid=(mp // tm,),
        in_specs=[
            pl.BlockSpec((tm, cin), lambda i: (i, 0)),
            pl.BlockSpec((cin, cout), lambda i: (0, 0)),
            pl.BlockSpec((1, cout), lambda i: (0, 0)),
        ],
        out_specs=pl.BlockSpec((tm, cout), lambda i: (i, 0)),
        compiler_params=pltpu.CompilerParams(dimension_semantics=("parallel",)),
    )(_pad_rows(x, mp), w, b)
    return out[:m]


def fused_tail(taps, xs, wg, b2, w3, b3, wsc, bsc, *, cap=256):
    m, k9 = taps.shape
    cin = xs.shape[1]
    ci = wg.shape[1]
    cout = w3.shape[1]
    tm, mp = _tile_rows(m, cap)
    out = pl.pallas_call(
        _fused_tail_kernel,
        out_shape=jax.ShapeDtypeStruct((mp, cout), jnp.float32),
        grid=(mp // tm,),
        in_specs=[
            pl.BlockSpec((tm, k9), lambda i: (i, 0)),     # concatenated taps
            pl.BlockSpec((tm, cin), lambda i: (i, 0)),    # strided-subsampled input
            pl.BlockSpec((k9, ci), lambda i: (0, 0)),     # block-diag grouped weight
            pl.BlockSpec((1, ci), lambda i: (0, 0)),
            pl.BlockSpec((ci, cout), lambda i: (0, 0)),   # conv3 weight
            pl.BlockSpec((1, cout), lambda i: (0, 0)),
            pl.BlockSpec((cin, cout), lambda i: (0, 0)),  # shortcut weight
            pl.BlockSpec((1, cout), lambda i: (0, 0)),
        ],
        out_specs=pl.BlockSpec((tm, cout), lambda i: (i, 0)),
        compiler_params=pltpu.CompilerParams(dimension_semantics=("parallel",)),
    )(_pad_rows(taps, mp), _pad_rows(xs, mp), wg, b2, w3, b3, wsc, bsc)
    return out[:m]


# ----------------------------------------------------------------------------
# host-side parameter folding / layout prep (plain JAX, small & vectorized)
# ----------------------------------------------------------------------------
def _fold_bn(w_oi, conv_bias, gamma, beta, mean, var):
    """Fold BN into a (Cout, Cin) 1x1 conv weight.
    Returns bf16 (Cin, Cout) matmul weight and f32 (1, Cout) additive bias."""
    scale = gamma / jnp.sqrt(var + EPS)
    w = (w_oi * scale[:, None]).T.astype(jnp.bfloat16)
    bias = jnp.zeros_like(mean) if conv_bias is None else conv_bias
    shift = (scale * (bias - mean) + beta).reshape(1, -1).astype(jnp.float32)
    return w, shift


def _grouped_to_dense(w2, groups):
    """(C, C//groups, 3, 3) grouped OIHW weight -> (9*C, C) block-diagonal dense
    weight matching channel-concatenated im2col taps (tap index k = ky*3 + kx)."""
    c, g = w2.shape[0], w2.shape[1]
    blocks = w2.reshape(groups, g, g, 3, 3)           # (G, o, i, ky, kx)
    blocks = jnp.transpose(blocks, (3, 4, 0, 2, 1))   # (ky, kx, G, i, o)
    eye = jnp.eye(groups, dtype=w2.dtype)
    dense = jnp.einsum("yxgio,gh->yxgiho", blocks, eye)   # (ky, kx, Gi, i, Gj, o)
    return dense.reshape(9 * c, c)


def _fold_bn_grouped(w2, groups, conv_bias, gamma, beta, mean, var):
    scale = gamma / jnp.sqrt(var + EPS)
    wg = (_grouped_to_dense(w2, groups) * scale[None, :]).astype(jnp.bfloat16)
    shift = (scale * (conv_bias - mean) + beta).reshape(1, -1).astype(jnp.float32)
    return wg, shift


def _build_taps_concat(x_nhwc, stride):
    """im2col 3x3 taps (padding=1, given stride) concatenated along channels.
    Returns (N*Ho*Wo, 9*C), Ho, Wo."""
    n, h, w, c = x_nhwc.shape
    ho = (h - 1) // stride + 1
    wo = (w - 1) // stride + 1
    xp = jnp.pad(x_nhwc, ((0, 0), (1, 1), (1, 1), (0, 0)))
    taps = []
    for ky in range(3):
        for kx in range(3):
            t = xp[:, ky:ky + stride * (ho - 1) + 1:stride,
                      kx:kx + stride * (wo - 1) + 1:stride, :]
            taps.append(t.reshape(n * ho * wo, c))
    return jnp.concatenate(taps, axis=1), ho, wo


def block_forward(x_nchw, p, pool_stride, groups=32):
    n, cin, h, w = x_nchw.shape
    cinter = p["conv1_w"].shape[0]
    cout = p["conv3_w"].shape[0]

    x = jnp.transpose(x_nchw, (0, 2, 3, 1)).astype(jnp.bfloat16)  # NHWC, bf16 activations

    # Fold BN into conv weights (f32 math) -> bf16 MXU weights + f32 biases.
    w1, b1 = _fold_bn(p["conv1_w"].reshape(cinter, cin), p["conv1_b"],
                      p["bn1_g"], p["bn1_b"], p["bn1_m"], p["bn1_v"])
    wg, b2 = _fold_bn_grouped(p["conv2_w"], groups, p["conv2_b"],
                              p["bn2_g"], p["bn2_b"], p["bn2_m"], p["bn2_v"])
    w3, b3 = _fold_bn(p["conv3_w"].reshape(cout, cinter), p["conv3_b"],
                      p["bn3_g"], p["bn3_b"], p["bn3_m"], p["bn3_v"])
    wsc, bsc = _fold_bn(p["sc_w"].reshape(cout, cin), None,
                        p["scbn_g"], p["scbn_b"], p["scbn_m"], p["scbn_v"])

    # Kernel 1: conv1 (1x1) + BN1 + ReLU  ->  (N*H*W, Cinter) bf16
    out1 = pointwise_bias_relu(x.reshape(n * h * w, cin), w1, b1)
    out1 = out1.reshape(n, h, w, cinter)

    # im2col taps concatenated along channels (bf16), strided shortcut input.
    taps, ho, wo = _build_taps_concat(out1, pool_stride)            # (Mo, 9*Cinter)
    xs = x[:, ::pool_stride, ::pool_stride, :].reshape(n * ho * wo, cin)

    # Kernel 2: gconv+BN2+ReLU + conv3+BN3 + shortcut conv+BN + add + ReLU (fused).
    out = fused_tail(taps, xs, wg, b2, w3, b3, wsc, bsc)            # (Mo, Cout) f32

    return jnp.transpose(out.reshape(n, ho, wo, cout), (0, 3, 1, 2))  # -> NCHW


# ----------------------------------------------------------------------------
# pure-JAX f32 reference (lax.conv) for correctness check
# ----------------------------------------------------------------------------
def ref_forward(x, p, stride):
    def conv(x, w, b, stride=1, pad=0, groups=1):
        y = jax.lax.conv_general_dilated(
            x, w, (stride, stride), [(pad, pad), (pad, pad)],
            feature_group_count=groups,
            dimension_numbers=("NCHW", "OIHW", "NCHW"))
        if b is not None:
            y = y + b[None, :, None, None]
        return y

    def bn(x, g, b, m, v):
        return (g[None, :, None, None] * (x - m[None, :, None, None])
                / jnp.sqrt(v[None, :, None, None] + EPS) + b[None, :, None, None])

    residual = bn(conv(x, p["sc_w"], None, stride=stride),
                  p["scbn_g"], p["scbn_b"], p["scbn_m"], p["scbn_v"])
    out = jax.nn.relu(bn(conv(x, p["conv1_w"], p["conv1_b"]),
                         p["bn1_g"], p["bn1_b"], p["bn1_m"], p["bn1_v"]))
    out = jax.nn.relu(bn(conv(out, p["conv2_w"], p["conv2_b"], stride=stride,
                              pad=1, groups=32),
                         p["bn2_g"], p["bn2_b"], p["bn2_m"], p["bn2_v"]))
    out = bn(conv(out, p["conv3_w"], p["conv3_b"]),
             p["bn3_g"], p["bn3_b"], p["bn3_m"], p["bn3_v"])
    return jax.nn.relu(residual + out)


# ----------------------------------------------------------------------------
def make_params(key, cin, cinter, cout, groups=32):
    ks = iter(jax.random.split(key, 32))
    def nrm(shape, s=0.1):
        return jax.random.normal(next(ks), shape, jnp.float32) * s
    def bn_params(c):
        return (jax.random.uniform(next(ks), (c,), jnp.float32, 0.5, 1.5),   # gamma
                nrm((c,)),                                                   # beta
                nrm((c,)),                                                   # running mean
                jax.random.uniform(next(ks), (c,), jnp.float32, 0.5, 1.5))   # running var
    p = {}
    p["conv1_w"] = nrm((cinter, cin, 1, 1)); p["conv1_b"] = nrm((cinter,))
    p["bn1_g"], p["bn1_b"], p["bn1_m"], p["bn1_v"] = bn_params(cinter)
    p["conv2_w"] = nrm((cinter, cinter // groups, 3, 3)); p["conv2_b"] = nrm((cinter,))
    p["bn2_g"], p["bn2_b"], p["bn2_m"], p["bn2_v"] = bn_params(cinter)
    p["conv3_w"] = nrm((cout, cinter, 1, 1)); p["conv3_b"] = nrm((cout,))
    p["bn3_g"], p["bn3_b"], p["bn3_m"], p["bn3_v"] = bn_params(cout)
    p["sc_w"] = nrm((cout, cin, 1, 1))
    p["scbn_g"], p["scbn_b"], p["scbn_m"], p["scbn_v"] = bn_params(cout)
    return p


if __name__ == "__main__":
    # interchannel must be divisible by groups=32; 128 keeps all outputs lane-dense.
    N, Cin, H, W = 2, 64, 16, 16
    Cinter, Cout = 128, 128
    pool_stride = 2

    key = jax.random.PRNGKey(0)
    kx_, kp_ = jax.random.split(key)
    x = jax.random.normal(kx_, (N, Cin, H, W), jnp.float32)
    params = make_params(kp_, Cin, Cinter, Cout)

    fwd = jax.jit(functools.partial(block_forward, pool_stride=pool_stride))
    out = jax.block_until_ready(fwd(x, params))

    ref = ref_forward(x, params, pool_stride)
    assert out.shape == ref.shape == (N, Cout, H // pool_stride, W // pool_stride)
    err = float(jnp.max(jnp.abs(out - ref)))
    # bf16 MXU operands with f32 accumulation -> loosened tolerance vs the f32 reference
    assert jnp.allclose(out, ref, atol=1e-1, rtol=5e-2), f"max abs err = {err}"

    print("KERNEL_OK")
</pallas_src>

<mosaic_0001>
module attributes {stable_mosaic.version = 11 : i64} {
  func.func @_pw_bias_relu_kernel(%arg0: i32, %arg1: memref<256x64xbf16, #tpu.memory_space<vmem>>, %arg2: memref<64x128xbf16, #tpu.memory_space<vmem>>, %arg3: memref<1x128xf32, #tpu.memory_space<vmem>>, %arg4: memref<256x128xbf16, #tpu.memory_space<vmem>>) attributes {dimension_semantics = [#tpu.dimension_semantics<parallel>], iteration_bounds = array<i64: 2>, scalar_prefetch = 0 : i64, scratch_operands = 0 : i64, tpu.core_type = #tpu.core_type<tc>, window_params = [{transform_indices = @transform_0, window_bounds = array<i64: 256, 64>}, {pipeline_mode = #tpu.pipeline_mode<synchronous>, transform_indices = @transform_1, window_bounds = array<i64: 64, 128>}, {pipeline_mode = #tpu.pipeline_mode<synchronous>, transform_indices = @transform_2, window_bounds = array<i64: 1, 128>}, {transform_indices = @transform_3, window_bounds = array<i64: 256, 128>}]} {
    %c0 = arith.constant 0 : index
    %c0_0 = arith.constant 0 : index
    %0 = vector.load %arg1[%c0, %c0_0] : memref<256x64xbf16, #tpu.memory_space<vmem>>, vector<256x64xbf16>
    %c0_1 = arith.constant 0 : index
    %c0_2 = arith.constant 0 : index
    %1 = vector.load %arg2[%c0_1, %c0_2] : memref<64x128xbf16, #tpu.memory_space<vmem>>, vector<64x128xbf16>
    %cst = arith.constant dense<0.000000e+00> : vector<256x128xf32>
    %2 = tpu.matmul %0, %1, %cst {dimension_numbers = #tpu.dot_dimension_numbers<[1], [0], [0], [1], [0, 0, 1, 1], [], []>} : vector<256x64xbf16>, vector<64x128xbf16>, vector<256x128xf32> -> vector<256x128xf32>
    %c0_3 = arith.constant 0 : index
    %c0_4 = arith.constant 0 : index
    %3 = vector.load %arg3[%c0_3, %c0_4] : memref<1x128xf32, #tpu.memory_space<vmem>>, vector<1x128xf32>
    %4 = vector.broadcast %3 : vector<1x128xf32> to vector<256x128xf32>
    %5 = arith.addf %2, %4 : vector<256x128xf32>
    %cst_5 = arith.constant 0.000000e+00 : f32
    %6 = vector.broadcast %cst_5 : f32 to vector<256x128xf32>
    %7 = arith.maximumf %5, %6 : vector<256x128xf32>
    %8 = arith.truncf %7 : vector<256x128xf32> to vector<256x128xbf16>
    %c0_6 = arith.constant 0 : index
    %c0_7 = arith.constant 0 : index
    %9 = vector.load %arg4[%c0_6, %c0_7] : memref<256x128xbf16, #tpu.memory_space<vmem>>, vector<256x128xbf16>
    tpu.vector_store %arg4[%c0_6, %c0_7], %8 {strides = array<i32>} : memref<256x128xbf16, #tpu.memory_space<vmem>>, vector<256x128xbf16>,
    return
  }
  func.func @transform_0(%arg0: i32) -> (i32, i32) {
    %c0_i32 = arith.constant 0 : i32
    %c0_i32_0 = arith.constant 0 : i32
    return %arg0, %c0_i32 : i32, i32
  }
  func.func @transform_1(%arg0: i32) -> (i32, i32) {
    %c0_i32 = arith.constant 0 : i32
    %c0_i32_0 = arith.constant 0 : i32
    %c0_i32_1 = arith.constant 0 : i32
    return %c0_i32, %c0_i32_0 : i32, i32
  }
  func.func @transform_2(%arg0: i32) -> (i32, i32) {
    %c0_i32 = arith.constant 0 : i32
    %c0_i32_0 = arith.constant 0 : i32
    %c0_i32_1 = arith.constant 0 : i32
    return %c0_i32, %c0_i32_0 : i32, i32
  }
  func.func @transform_3(%arg0: i32) -> (i32, i32) {
    %c0_i32 = arith.constant 0 : i32
    %c0_i32_0 = arith.constant 0 : i32
    return %arg0, %c0_i32 : i32, i32
  }
}

module attributes {stable_mosaic.version = 11 : i64} {
  func.func @_fused_tail_kernel(%arg0: i32, %arg1: memref<64x1152xbf16, #tpu.memory_space<vmem>>, %arg2: memref<64x64xbf16, #tpu.memory_space<vmem>>, %arg3: memref<1152x128xbf16, #tpu.memory_space<vmem>>, %arg4: memref<1x128xf32, #tpu.memory_space<vmem>>, %arg5: memref<128x128xbf16, #tpu.memory_space<vmem>>, %arg6: memref<1x128xf32, #tpu.memory_space<vmem>>, %arg7: memref<64x128xbf16, #tpu.memory_space<vmem>>, %arg8: memref<1x128xf32, #tpu.memory_space<vmem>>, %arg9: memref<64x128xf32, #tpu.memory_space<vmem>>) attributes {dimension_semantics = [#tpu.dimension_semantics<parallel>], iteration_bounds = array<i64: 2>, scalar_prefetch = 0 : i64, scratch_operands = 0 : i64, tpu.core_type = #tpu.core_type<tc>, window_params = [{transform_indices = @transform_0, window_bounds = array<i64: 64, 1152>}, {transform_indices = @transform_1, window_bounds = array<i64: 64, 64>}, {pipeline_mode = #tpu.pipeline_mode<synchronous>, transform_indices = @transform_2, window_bounds = array<i64: 1152, 128>}, {pipeline_mode = #tpu.pipeline_mode<synchronous>, transform_indices = @transform_3, window_bounds = array<i64: 1, 128>}, {pipeline_mode = #tpu.pipeline_mode<synchronous>, transform_indices = @transform_4, window_bounds = array<i64: 128, 128>}, {pipeline_mode = #tpu.pipeline_mode<synchronous>, transform_indices = @transform_5, window_bounds = array<i64: 1, 128>}, {pipeline_mode = #tpu.pipeline_mode<synchronous>, transform_indices = @transform_6, window_bounds = array<i64: 64, 128>}, {pipeline_mode = #tpu.pipeline_mode<synchronous>, transform_indices = @transform_7, window_bounds = array<i64: 1, 128>}, {transform_indices = @transform_8, window_bounds = array<i64: 64, 128>}]} {
    %c0 = arith.constant 0 : index
    %c0_0 = arith.constant 0 : index
    %0 = vector.load %arg1[%c0, %c0_0] : memref<64x1152xbf16, #tpu.memory_space<vmem>>, vector<64x1152xbf16>
    %c0_1 = arith.constant 0 : index
    %c0_2 = arith.constant 0 : index
    %1 = vector.load %arg3[%c0_1, %c0_2] : memref<1152x128xbf16, #tpu.memory_space<vmem>>, vector<1152x128xbf16>
    %cst = arith.constant dense<0.000000e+00> : vector<64x128xf32>
    %2 = tpu.matmul %0, %1, %cst {dimension_numbers = #tpu.dot_dimension_numbers<[1], [0], [0], [1], [0, 0, 1, 1], [], []>} : vector<64x1152xbf16>, vector<1152x128xbf16>, vector<64x128xf32> -> vector<64x128xf32>
    %c0_3 = arith.constant 0 : index
    %c0_4 = arith.constant 0 : index
    %3 = vector.load %arg4[%c0_3, %c0_4] : memref<1x128xf32, #tpu.memory_space<vmem>>, vector<1x128xf32>
    %4 = vector.broadcast %3 : vector<1x128xf32> to vector<64x128xf32>
    %5 = arith.addf %2, %4 : vector<64x128xf32>
    %cst_5 = arith.constant 0.000000e+00 : f32
    %6 = vector.broadcast %cst_5 : f32 to vector<64x128xf32>
    %7 = arith.maximumf %5, %6 : vector<64x128xf32>
    %8 = arith.truncf %7 : vector<64x128xf32> to vector<64x128xbf16>
    %c0_6 = arith.constant 0 : index
    %c0_7 = arith.constant 0 : index
    %9 = vector.load %arg5[%c0_6, %c0_7] : memref<128x128xbf16, #tpu.memory_space<vmem>>, vector<128x128xbf16>
    %cst_8 = arith.constant dense<0.000000e+00> : vector<64x128xf32>
    %10 = tpu.matmul %8, %9, %cst_8 {dimension_numbers = #tpu.dot_dimension_numbers<[1], [0], [0], [1], [0, 0, 1, 1], [], []>} : vector<64x128xbf16>, vector<128x128xbf16>, vector<64x128xf32> -> vector<64x128xf32>
    %c0_9 = arith.constant 0 : index
    %c0_10 = arith.constant 0 : index
    %11 = vector.load %arg6[%c0_9, %c0_10] : memref<1x128xf32, #tpu.memory_space<vmem>>, vector<1x128xf32>
    %12 = vector.broadcast %11 : vector<1x128xf32> to vector<64x128xf32>
    %13 = arith.addf %10, %12 : vector<64x128xf32>
    %c0_11 = arith.constant 0 : index
    %c0_12 = arith.constant 0 : index
    %14 = vector.load %arg2[%c0_11, %c0_12] : memref<64x64xbf16, #tpu.memory_space<vmem>>, vector<64x64xbf16>
    %c0_13 = arith.constant 0 : index
    %c0_14 = arith.constant 0 : index
    %15 = vector.load %arg7[%c0_13, %c0_14] : memref<64x128xbf16, #tpu.memory_space<vmem>>, vector<64x128xbf16>
    %cst_15 = arith.constant dense<0.000000e+00> : vector<64x128xf32>
    %16 = tpu.matmul %14, %15, %cst_15 {dimension_numbers = #tpu.dot_dimension_numbers<[1], [0], [0], [1], [0, 0, 1, 1], [], []>} : vector<64x64xbf16>, vector<64x128xbf16>, vector<64x128xf32> -> vector<64x128xf32>
    %c0_16 = arith.constant 0 : index
    %c0_17 = arith.constant 0 : index
    %17 = vector.load %arg8[%c0_16, %c0_17] : memref<1x128xf32, #tpu.memory_space<vmem>>, vector<1x128xf32>
    %18 = vector.broadcast %17 : vector<1x128xf32> to vector<64x128xf32>
    %19 = arith.addf %16, %18 : vector<64x128xf32>
    %20 = arith.addf %13, %19 : vector<64x128xf32>
    %cst_18 = arith.constant 0.000000e+00 : f32
    %21 = vector.broadcast %cst_18 : f32 to vector<64x128xf32>
    %22 = arith.maximumf %20, %21 : vector<64x128xf32>
    %c0_19 = arith.constant 0 : index
    %c0_20 = arith.constant 0 : index
    %23 = vector.load %arg9[%c0_19, %c0_20] : memref<64x128xf32, #tpu.memory_space<vmem>>, vector<64x128xf32>
    tpu.vector_store %arg9[%c0_19, %c0_20], %22 {strides = array<i32>} : memref<64x128xf32, #tpu.memory_space<vmem>>, vector<64x128xf32>,
    return
  }
  func.func @transform_0(%arg0: i32) -> (i32, i32) {
    %c0_i32 = arith.constant 0 : i32
    %c0_i32_0 = arith.constant 0 : i32
    return %arg0, %c0_i32 : i32, i32
  }
  func.func @transform_1(%arg0: i32) -> (i32, i32) {
    %c0_i32 = arith.constant 0 : i32
    %c0_i32_0 = arith.constant 0 : i32
    return %arg0, %c0_i32 : i32, i32
  }
  func.func @transform_2(%arg0: i32) -> (i32, i32) {
    %c0_i32 = arith.constant 0 : i32
    %c0_i32_0 = arith.constant 0 : i32
    %c0_i32_1 = arith.constant 0 : i32
    return %c0_i32, %c0_i32_0 : i32, i32
  }
  func.func @transform_3(%arg0: i32) -> (i32, i32) {
    %c0_i32 = arith.constant 0 : i32
    %c0_i32_0 = arith.constant 0 : i32
    %c0_i32_1 = arith.constant 0 : i32
    return %c0_i32, %c0_i32_0 : i32, i32
  }
  func.func @transform_4(%arg0: i32) -> (i32, i32) {
    %c0_i32 = arith.constant 0 : i32
    %c0_i32_0 = arith.constant 0 : i32
    %c0_i32_1 = arith.constant 0 : i32
    return %c0_i32, %c0_i32_0 : i32, i32
  }
  func.func @transform_5(%arg0: i32) -> (i32, i32) {
    %c0_i32 = arith.constant 0 : i32
    %c0_i32_0 = arith.constant 0 : i32
    %c0_i32_1 = arith.constant 0 : i32
    return %c0_i32, %c0_i32_0 : i32, i32
  }
  func.func @transform_6(%arg0: i32) -> (i32, i32) {
    %c0_i32 = arith.constant 0 : i32
    %c0_i32_0 = arith.constant 0 : i32
    %c0_i32_1 = arith.constant 0 : i32
    return %c0_i32, %c0_i32_0 : i32, i32
  }
  func.func @transform_7(%arg0: i32) -> (i32, i32) {
    %c0_i32 = arith.constant 0 : i32
    %c0_i32_0 = arith.constant 0 : i32
    %c0_i32_1 = arith.constant 0 : i32
    return %c0_i32, %c0_i32_0 : i32, i32
  }
  func.func @transform_8(%arg0: i32) -> (i32, i32) {
    %c0_i32 = arith.constant 0 : i32
    %c0_i32_0 = arith.constant 0 : i32
    return %arg0, %c0_i32 : i32, i32
  }
}

</mosaic_0001>

<bundles_post_ra>
// kernel: block_forward.2
= control target key start
LH: loop header
LB: loop body
LE: loop exit
PB: predicated region body
PF: predicated region fallthrough
CT: control target
= control target key end

     0   :  { %s1115_s12 = smov 0   ;;  %s1240_s0 = inlined_call_operand.vmem [shape: bf16[512,64], index: 0, kind: input, shape index: {}]   ;;  %s1241_s1 = inlined_call_operand.vmem [shape: bf16[64,128], index: 1, kind: input, shape index: {}]   ;;  %s1242_s2 = inlined_call_operand.vmem [shape: f32[1,128], index: 2, kind: input, shape index: {}]   ;;  %s1243_s3 = inlined_call_operand.vmem [shape: bf16[512,128], index: 3, kind: output, shape index: {}]  }
   0x1 LB: > { %s784_s13 = sadd.s32 4294967295, %s1093_s12   ;;  %p788_p0 = scmp.ge.s32.totalorder %s1093_s12, 1  ;;  %s1093_s12 = sphi %s1115_s12, %s13_s12  }
   0x2   : > { %p138_p1 = scmp.lt.s32.totalorder %s1093_s12, 3 }
   0x4   : > { %p139_p2 = pnand %p788_p0, %p138_p1 }
   0x5   : > { %v1067_v0 = vld [vmem:[%s1241_s1] sm:$0xff] (!%p139_p2)   ;;  %s789_s16 = sshll.u32 (!%p139_p2), %s784_s13, 5  ;;  %v1068_v1 = vld [vmem:[%s1241_s1 + $0x8] sm:$0xff] (!%p139_p2)   ;;  %v1069_v2 = vld [vmem:[%s1241_s1 + $0x10] sm:$0xff] (!%p139_p2)   ;;  %vm326_vm0 = vcmask (!%p139_p2), 523264  }
   0x6   : > { %142 = sbr.rel (%p139_p2) target bundleno = 268 (0x10c), region = 32  ;;  %p163_p3 = scmp.lt.s32.totalorder (!%p139_p2), %s789_s16, 63  ;;  %1011 = vmatprep.subr.bf16.mxu0 (!%p139_p2), %v1067_v0  ;;  %1051 = vmatprep.subr.bf16.mxu1 (!%p139_p2), %v1067_v0  ;;  %v1070_v3 = vld [vmem:[%s1241_s1 + $0x18] sm:$0xff] (!%p139_p2)   ;;  %v1180_v20 = vld [vmem:[%s1242_s2] ss:$0 sm:$0xff] (!%p139_p2) }
   0x7   : > { %1012 = vmatpush3.bf16.msra.mxu0 (!%p139_p2), %v1067_v0  ;;  %1055 = vmatpush3.bf16.msra.mxu1 (!%p139_p2), %v1067_v0 }
   0x8   : > { %1013 = vmatprep.subr.bf16.mxu0 (!%p139_p2), %v1068_v1  ;;  %1052 = vmatprep.subr.bf16.mxu1 (!%p139_p2), %v1068_v1 }
   0xb   : > { %1014 = vmatpush3.bf16.msra.mxu0 (!%p139_p2), %v1068_v1  ;;  %1056 = vmatpush3.bf16.msra.mxu1 (!%p139_p2), %v1068_v1 }
   0xc   : > { %1015 = vmatprep.subr.bf16.mxu0 (!%p139_p2), %v1069_v2  ;;  %1053 = vmatprep.subr.bf16.mxu1 (!%p139_p2), %v1069_v2 }
   0xd   : > { %s1245_s16 = smov (!%p163_p3, %s789_s16), 63 }
   0xe   : > { %s790_s21 = sshll.u32 %s1245_s16, 2 }
   0xf   : > { %s1143_s26 = scalar_lea.vmem %s1240_s0, %s790_s21  ;;  %1016 = vmatpush3.bf16.msra.mxu0 %v1069_v2  ;;  %1057 = vmatpush3.bf16.msra.mxu1 %v1069_v2  ;;  %s1195_s4 = scalar_lea.vmem %s1243_s3, %s790_s21 }
  0x10   : > { %v1071_v4 = vld [vmem:[%s1143_s26] sm:$0xff]   ;;  %1017 = vmatprep.subr.bf16.mxu0 %v1070_v3  ;;  %1054 = vmatprep.subr.bf16.mxu1 %v1070_v3  ;;  %v1073_v6 = vld [vmem:[%s1143_s26 + $0x8] sm:$0xff]   ;;  %v1075_v8 = vld [vmem:[%s1143_s26 + $0x10] sm:$0xff]  }
  0x11   : > { %v1072_v5 = vld [vmem:[%s1143_s26 + $0x40] sm:$0xff]   ;;  %1019 = vmatprep.mubr.msk.bf16.mxu0 %vm326_vm0, %v1071_v4  ;;  %v1074_v7 = vld [vmem:[%s1143_s26 + $0x48] sm:$0xff]   ;;  %v1076_v9 = vld [vmem:[%s1143_s26 + $0x50] sm:$0xff]  }
  0x12   : > { %1035 = vmatprep.mubr.msk.bf16.mxu1 %vm326_vm0, %v1072_v5  ;;  %v1077_v10 = vld [vmem:[%s1143_s26 + $0x18] sm:$0xff]   ;;  %v1079_v12 = vld [vmem:[%s1143_s26 + $0x20] sm:$0xff]   ;;  %v1081_v14 = vld [vmem:[%s1143_s26 + $0x28] sm:$0xff]  }
  0x13   : > { %1018 = vmatpush3.bf16.msra.mxu0 %v1070_v3  ;;  %1058 = vmatpush3.bf16.msra.mxu1 %v1070_v3  ;;  %v1078_v11 = vld [vmem:[%s1143_s26 + $0x58] sm:$0xff]   ;;  %v1080_v13 = vld [vmem:[%s1143_s26 + $0x60] sm:$0xff]   ;;  %v1082_v15 = vld [vmem:[%s1143_s26 + $0x68] sm:$0xff]  }
  0x14   : > { %v1083_v16 = vld [vmem:[%s1143_s26 + $0x30] sm:$0xff]   ;;  %v1085_v18 = vld [vmem:[%s1143_s26 + $0x38] sm:$0xff]  }
  0x15   : > { %v1084_v17 = vld [vmem:[%s1143_s26 + $0x70] sm:$0xff]   ;;  %v1086_v19 = vld [vmem:[%s1143_s26 + $0x78] sm:$0xff]  }
  0x16   : > { %1020 = vmatmul.mubr.msk.bf16.vlgmr.msra.gmra.mrb[0].mxu0 %vm326_vm0, %v1073_v6  ;;  %1036 = vmatmul.mubr.msk.bf16.vlgmr.msra.gmra.mrb[0].mxu1 %vm326_vm0, %v1074_v7 }
  0x17   : > { %1023 = vmatprep.mubr.msk.bf16.mxu0 %vm326_vm0, %v1075_v8  ;;  %1039 = vmatprep.mubr.msk.bf16.mxu1 %vm326_vm0, %v1076_v9 }
  0x1e   : > { %1024 = vmatmul.mubr.msk.bf16.gmra.mrb[4].mxu0 %vm326_vm0, %v1077_v10  ;;  %1040 = vmatmul.mubr.msk.bf16.gmra.mrb[4].mxu1 %vm326_vm0, %v1078_v11 }
  0x1f   : > { %1027 = vmatprep.mubr.msk.bf16.mxu0 %vm326_vm0, %v1079_v12  ;;  %1043 = vmatprep.mubr.msk.bf16.mxu1 %vm326_vm0, %v1080_v13 }
  0x26   : > { %1028 = vmatmul.mubr.msk.bf16.gmra.mrb[8].mxu0 %vm326_vm0, %v1081_v14  ;;  %1044 = vmatmul.mubr.msk.bf16.gmra.mrb[8].mxu1 %vm326_vm0, %v1082_v15 }
  0x27   : > { %1031 = vmatprep.mubr.msk.bf16.mxu0 %vm326_vm0, %v1083_v16  ;;  %1047 = vmatprep.mubr.msk.bf16.mxu1 %vm326_vm0, %v1084_v17 }
  0x2e   : > { %1032 = vmatmul.mubr.msk.bf16.gmra.mrb[12].mxu0 %vm326_vm0, %v1085_v18  ;;  %1048 = vmatmul.mubr.msk.bf16.gmra.mrb[12].mxu1 %vm326_vm0, %v1086_v19 }
  0xe9   : > { %v1021_v21 = vpop.f32.mrb[0].mxu0  ;;  %v1037_v22 = vpop.f32.mrb[0].mxu1 }
  0xea   : > { %v418_v23 = vadd.f32 %v1021_v21, %v1180_v20  ;;  %v482_v24 = vadd.f32 %v1037_v22, %v1180_v20  ;;  %v409_v25 = vpop.f32.mrb[1].mxu0  ;;  %v473_v26 = vpop.f32.mrb[1].mxu1 }
  0xeb   : > { %v410_v27 = vadd.f32 %v1180_v20, %v409_v25  ;;  %v474_v28 = vadd.f32 %v1180_v20, %v473_v26  ;;  %v1022_v29 = vpop.f32.mrb[2].mxu0  ;;  %v1038_v30 = vpop.f32.mrb[2].mxu1 }
  0xec   : > { %v421_v31 = vadd.f32 %v1022_v29, %v1180_v20  ;;  %v485_v32 = vadd.f32 %v1038_v30, %v1180_v20  ;;  %v412_v33 = vpop.f32.mrb[3].mxu0  ;;  %v476_v34 = vpop.f32.mrb[3].mxu1  ;;  %v538_v37 = vmax.f32 %v418_v23, 0.0  ;;  %v554_v38 = vmax.f32 %v482_v24, 0.0 }
  0xed   : > { %v413_v35 = vadd.f32 %v1180_v20, %v412_v33  ;;  %v477_v36 = vadd.f32 %v1180_v20, %v476_v34  ;;  %v536_v41 = vmax.f32 %v410_v27, 0.0  ;;  %v552_v42 = vmax.f32 %v474_v28, 0.0 }
  0xee   : > { %v539_v39 = vmax.f32 %v421_v31, 0.0  ;;  %v555_v40 = vmax.f32 %v485_v32, 0.0 }
  0xef   : > { %v537_v43 = vmax.f32 %v413_v35, 0.0  ;;  %v553_v44 = vmax.f32 %v477_v36, 0.0 }
  0xf0   : > { %v904_v45 = vpack.c.bf16 %v539_v39, %v538_v37  ;;  %v944_v46 = vpack.c.bf16 %v555_v40, %v554_v38 }
  0xf1   : > { %v899_v47 = vpack.c.bf16 %v537_v43, %v536_v41  ;;  %v939_v48 = vpack.c.bf16 %v553_v44, %v552_v42  ;;  %v1025_v49 = vpop.f32.mrb[4].mxu0  ;;  %v1041_v50 = vpop.f32.mrb[4].mxu1 }
  0xf2   : > { %976 = vst [vmem:[%s1195_s4 + $0x8] sm:$0xff] %v904_v45   ;;  %984 = vst [vmem:[%s1195_s4 + $0x48] sm:$0xff] %v944_v46   ;;  %v434_v51 = vadd.f32 %v1025_v49, %v1180_v20  ;;  %v498_v52 = vadd.f32 %v1041_v50, %v1180_v20  ;;  %v425_v53 = vpop.f32.mrb[5].mxu0  ;;  %v489_v54 = vpop.f32.mrb[5].mxu1 }
  0xf3   : > { %900 = vst [vmem:[%s1195_s4] sm:$0xff] %v899_v47   ;;  %983 = vst [vmem:[%s1195_s4 + $0x40] sm:$0xff] %v939_v48   ;;  %v426_v55 = vadd.f32 %v1180_v20, %v425_v53  ;;  %v490_v56 = vadd.f32 %v1180_v20, %v489_v54  ;;  %v1026_v57 = vpop.f32.mrb[6].mxu0  ;;  %v1042_v58 = vpop.f32.mrb[6].mxu1 }
  0xf4   : > { %v437_v59 = vadd.f32 %v1026_v57, %v1180_v20  ;;  %v501_v60 = vadd.f32 %v1042_v58, %v1180_v20  ;;  %v428_v61 = vpop.f32.mrb[7].mxu0  ;;  %v492_v62 = vpop.f32.mrb[7].mxu1  ;;  %v542_v1 = vmax.f32 %v434_v51, 0.0  ;;  %v558_v2 = vmax.f32 %v498_v52, 0.0 }
  0xf5   : > { %v429_v63 = vadd.f32 %v1180_v20, %v428_v61  ;;  %v493_v0 = vadd.f32 %v1180_v20, %v492_v62  ;;  %v540_v5 = vmax.f32 %v426_v55, 0.0  ;;  %v556_v6 = vmax.f32 %v490_v56, 0.0 }
  0xf6   : > { %v543_v3 = vmax.f32 %v437_v59, 0.0  ;;  %v559_v4 = vmax.f32 %v501_v60, 0.0 }
  0xf7   : > { %v541_v7 = vmax.f32 %v429_v63, 0.0  ;;  %v557_v8 = vmax.f32 %v493_v0, 0.0 }
  0xf8   : > { %v914_v9 = vpack.c.bf16 %v543_v3, %v542_v1  ;;  %v954_v10 = vpack.c.bf16 %v559_v4, %v558_v2 }
  0xf9   : > { %v909_v11 = vpack.c.bf16 %v541_v7, %v540_v5  ;;  %v949_v12 = vpack.c.bf16 %v557_v8, %v556_v6  ;;  %v1029_v13 = vpop.f32.mrb[8].mxu0  ;;  %v1045_v14 = vpop.f32.mrb[8].mxu1 }
  0xfa   : > { %978 = vst [vmem:[%s1195_s4 + $0x18] sm:$0xff] %v914_v9   ;;  %986 = vst [vmem:[%s1195_s4 + $0x58] sm:$0xff] %v954_v10   ;;  %v450_v15 = vadd.f32 %v1029_v13, %v1180_v20  ;;  %v514_v16 = vadd.f32 %v1045_v14, %v1180_v20  ;;  %v441_v17 = vpop.f32.mrb[9].mxu0  ;;  %v505_v18 = vpop.f32.mrb[9].mxu1 }
  0xfb   : > { %977 = vst [vmem:[%s1195_s4 + $0x10] sm:$0xff] %v909_v11   ;;  %985 = vst [vmem:[%s1195_s4 + $0x50] sm:$0xff] %v949_v12   ;;  %v442_v19 = vadd.f32 %v1180_v20, %v441_v17  ;;  %v506_v21 = vadd.f32 %v1180_v20, %v505_v18  ;;  %v1030_v22 = vpop.f32.mrb[10].mxu0  ;;  %v1046_v23 = vpop.f32.mrb[10].mxu1 }
  0xfc   : > { %v453_v24 = vadd.f32 %v1030_v22, %v1180_v20  ;;  %v517_v25 = vadd.f32 %v1046_v23, %v1180_v20  ;;  %v444_v26 = vpop.f32.mrb[11].mxu0  ;;  %v508_v27 = vpop.f32.mrb[11].mxu1  ;;  %v546_v30 = vmax.f32 %v450_v15, 0.0  ;;  %v562_v31 = vmax.f32 %v514_v16, 0.0 }
  0xfd   : > { %v445_v28 = vadd.f32 %v1180_v20, %v444_v26  ;;  %v509_v29 = vadd.f32 %v1180_v20, %v508_v27  ;;  %v544_v34 = vmax.f32 %v442_v19, 0.0  ;;  %v560_v35 = vmax.f32 %v506_v21, 0.0 }
  0xfe   : > { %v547_v32 = vmax.f32 %v453_v24, 0.0  ;;  %v563_v33 = vmax.f32 %v517_v25, 0.0 }
  0xff   : > { %v545_v36 = vmax.f32 %v445_v28, 0.0  ;;  %v561_v37 = vmax.f32 %v509_v29, 0.0 }
 0x100   : > { %v924_v38 = vpack.c.bf16 %v547_v32, %v546_v30  ;;  %v964_v39 = vpack.c.bf16 %v563_v33, %v562_v31 }
 0x101   : > { %v919_v40 = vpack.c.bf16 %v545_v36, %v544_v34  ;;  %v959_v41 = vpack.c.bf16 %v561_v37, %v560_v35  ;;  %v1033_v42 = vpop.f32.mrb[12].mxu0  ;;  %v1049_v43 = vpop.f32.mrb[12].mxu1 }
 0x102   : > { %980 = vst [vmem:[%s1195_s4 + $0x28] sm:$0xff] %v924_v38   ;;  %988 = vst [vmem:[%s1195_s4 + $0x68] sm:$0xff] %v964_v39   ;;  %v466_v44 = vadd.f32 %v1033_v42, %v1180_v20  ;;  %v530_v45 = vadd.f32 %v1049_v43, %v1180_v20  ;;  %v457_v46 = vpop.f32.mrb[13].mxu0  ;;  %v521_v47 = vpop.f32.mrb[13].mxu1 }
 0x103   : > { %979 = vst [vmem:[%s1195_s4 + $0x20] sm:$0xff] %v919_v40   ;;  %987 = vst [vmem:[%s1195_s4 + $0x60] sm:$0xff] %v959_v41   ;;  %v458_v48 = vadd.f32 %v1180_v20, %v457_v46  ;;  %v522_v49 = vadd.f32 %v1180_v20, %v521_v47  ;;  %v1034_v50 = vpop.f32.mrb[14].mxu0  ;;  %v1050_v51 = vpop.f32.mrb[14].mxu1 }
 0x104   : > { %v469_v52 = vadd.f32 %v1034_v50, %v1180_v20  ;;  %v533_v53 = vadd.f32 %v1050_v51, %v1180_v20  ;;  %v460_v54 = vpop.f32.mrb[15].mxu0  ;;  %v524_v55 = vpop.f32.mrb[15].mxu1  ;;  %v550_v58 = vmax.f32 %v466_v44, 0.0  ;;  %v566_v59 = vmax.f32 %v530_v45, 0.0 }
 0x105   : > { %v461_v56 = vadd.f32 %v1180_v20, %v460_v54  ;;  %v525_v57 = vadd.f32 %v1180_v20, %v524_v55  ;;  %v548_v62 = vmax.f32 %v458_v48, 0.0  ;;  %v564_v63 = vmax.f32 %v522_v49, 0.0 }
 0x106   : > { %v551_v60 = vmax.f32 %v469_v52, 0.0  ;;  %v567_v61 = vmax.f32 %v533_v53, 0.0 }
 0x107   : > { %v549_v0 = vmax.f32 %v461_v56, 0.0  ;;  %v565_v1 = vmax.f32 %v525_v57, 0.0 }
 0x108   : > { %v934_v2 = vpack.c.bf16 %v551_v60, %v550_v58  ;;  %v974_v3 = vpack.c.bf16 %v567_v61, %v566_v59 }
 0x109   : > { %v929_v4 = vpack.c.bf16 %v549_v0, %v548_v62  ;;  %v969_v5 = vpack.c.bf16 %v565_v1, %v564_v63 }
 0x10a   : > { %982 = vst [vmem:[%s1195_s4 + $0x38] sm:$0xff] %v934_v2   ;;  %990 = vst [vmem:[%s1195_s4 + $0x78] sm:$0xff] %v974_v3  }
 0x10b   : > { %981 = vst [vmem:[%s1195_s4 + $0x30] sm:$0xff] %v929_v4   ;;  %989 = vst [vmem:[%s1195_s4 + $0x70] sm:$0xff] %v969_v5  }
 0x10c PF: > { %s13_s12 = sadd.s32 1, %s1093_s12  }
 0x10d   : > { %p10_p4 = scmp.ge.s32.totalorder %s13_s12, 4  }
 0x10f   :  { %12 = sbr.rel (!%p10_p4) target bundleno = 1 (0x1), region = 62 }

// kernel: block_forward.3
= control target key start
LH: loop header
LB: loop body
LE: loop exit
PB: predicated region body
PF: predicated region fallthrough
CT: control target
= control target key end

     0   :  { %13 = vsyncpa [#allocation3], 0  ;;  %s3044_s0 = inlined_call_operand.vmem [shape: bf16[128,1152], index: 0, kind: input, shape index: {}]   ;;  %s3045_s1 = inlined_call_operand.vmem [shape: bf16[128,64], index: 1, kind: input, shape index: {}]   ;;  %s3046_s2 = inlined_call_operand.vmem [shape: bf16[1152,128], index: 2, kind: input, shape index: {}]   ;;  %s3047_s3 = inlined_call_operand.vmem [shape: f32[1,128], index: 3, kind: input, shape index: {}]   ;;  %s3048_s4 = inlined_call_operand.vmem [shape: bf16[128,128], index: 4, kind: input, shape index: {}]   ;;  %s3049_s5 = inlined_call_operand.vmem [shape: f32[1,128], index: 5, kind: input, shape index: {}]   ;;  %s3050_s6 = inlined_call_operand.vmem [shape: bf16[64,128], index: 6, kind: input, shape index: {}]   ;;  %s3051_s7 = inlined_call_operand.vmem [shape: f32[1,128], index: 7, kind: input, shape index: {}]   ;;  %s3052_s8 = inlined_call_operand.hbm [shape: f32[128,128], index: 8, kind: output, shape index: {}]  }
   0x1   :  { %15 = vsyncpa [#allocation3 + $0x1], 0  ;;  %s2598_s27 = smov 0   ;;  %s2600_s28 = smov 0  }
   0x2   :  { %s2602_s29 = smov 0   ;;  %s2604_s30 = smov 0  }
   0x3 LB: > { %s2619_s9 = sadd.s32 4294967295, %s2548_s30   ;;  %s1870_s10 = sadd.s32 4294967294, %s2548_s30   ;;  %s2548_s30 = sphi %s2604_s30, %s3058_s30   ;;  %s2544_s29 = sphi %s2602_s29, %s3057_s29   ;;  %s2540_s28 = sphi %s2600_s28, %s3056_s28   ;;  %s2536_s27 = sphi %s2598_s27, %s3055_s27  }
   0x4   : > { %s2623_s11 = sadd.s32 1, %s2548_s30   ;;  %s206_s12 = sadd.s32 1, %s2544_s29 }
   0x5   : > { %s203_s13 = ssub.s32 %s2548_s30, %s2623_s11  ;;  %p216_p0 = scmp.ne.s32.totalorder %s2544_s29, %s2540_s28 }
   0x6   : > { %p204_p1 = scmp.eq.s32.totalorder %s203_s13, 0  ;;  %p217_p2 = scmp.eq.s32.totalorder %s2619_s9, 1 }
   0x7   : > { %p222_p3 = scmp.ne.s32.totalorder %s2540_s28, %s2536_s27  ;;  %p223_p4 = scmp.eq.s32.totalorder %s1870_s10, 1 }
   0x8   : > { %s2634_s14 = scalar_select %p204_p1, %s2544_s29, %s206_s12  }
   0x9   : > { %p2636_p5 = por %p217_p2, %p216_p0  ;;  %p2640_p6 = por %p223_p4, %p222_p3 }
   0xa   : > { %p1873_p7 = scmp.ge.s32.totalorder %s2548_s30, 1  ;;  %p278_p8 = scmp.lt.s32.totalorder %s2548_s30, 3 }
   0xc   : > { %p279_p9 = pnand %p1873_p7, %p278_p8 }
   0xd   : > { %v2346_v0 = vld [vmem:[%s3046_s2 + $0x40] sm:$0xff] (!%p279_p9)   ;;  %v2350_v4 = vld [vmem:[%s3046_s2 + $0x48] sm:$0xff] (!%p279_p9)   ;;  %v2354_v8 = vld [vmem:[%s3046_s2 + $0x50] sm:$0xff] (!%p279_p9)   ;;  %s1875_s19 = sshll.u32 (!%p279_p9), %s2619_s9, 3  ;;  %vm1680_vm0 = vcmask (!%p279_p9), 523264   ;;  %s2550_s22 = smov (!%p279_p9), [#allocation2]  }
   0xe   : > { %282 = sbr.rel (%p279_p9) target bundleno = 586 (0x24a), region = 52  ;;  %v2347_v1 = vld [vmem:[%s3046_s2] sm:$0xff] (!%p279_p9)   ;;  %2016 = vmatprep.subr.bf16.mxu0 (!%p279_p9), %v2346_v0  ;;  %v2351_v5 = vld [vmem:[%s3046_s2 + $0x8] sm:$0xff] (!%p279_p9)   ;;  %v2355_v9 = vld [vmem:[%s3046_s2 + $0x10] sm:$0xff] (!%p279_p9)   ;;  %p319_p10 = scmp.lt.s32.totalorder (!%p279_p9), %s1875_s19, 15 }
   0xf   : > { %v2348_v2 = vld [vmem:[%s3046_s2 + $0xc0] sm:$0xff] (!%p279_p9)   ;;  %2017 = vmatpush3.bf16.msra.mxu0 (!%p279_p9), %v2347_v1  ;;  %v2352_v6 = vld [vmem:[%s3046_s2 + $0xc8] sm:$0xff] (!%p279_p9)   ;;  %v2356_v10 = vld [vmem:[%s3046_s2 + $0xd0] sm:$0xff] (!%p279_p9)  }
  0x10   : > { %v2349_v3 = vld [vmem:[%s3046_s2 + $0x80] sm:$0xff] (!%p279_p9)   ;;  %2056 = vmatprep.subr.bf16.mxu1 (!%p279_p9), %v2348_v2  ;;  %2018 = vmatprep.subr.bf16.mxu0 (!%p279_p9), %v2350_v4  ;;  %v2353_v7 = vld [vmem:[%s3046_s2 + $0x88] sm:$0xff] (!%p279_p9)   ;;  %v2357_v11 = vld [vmem:[%s3046_s2 + $0x90] sm:$0xff] (!%p279_p9)  }
  0x11   : > { %2057 = vmatpush3.bf16.msra.mxu1 (!%p279_p9), %v2349_v3  ;;  %v2358_v12 = vld [vmem:[%s3046_s2 + $0x58] sm:$0xff] (!%p279_p9)   ;;  %v2362_v16 = vld [vmem:[%s3046_s2 + $0x60] sm:$0xff] (!%p279_p9)   ;;  %v2366_v20 = vld [vmem:[%s3046_s2 + $0x68] sm:$0xff] (!%p279_p9)  }
  0x12   : > { %2058 = vmatprep.subr.bf16.mxu1 (!%p279_p9), %v2352_v6  ;;  %v2359_v13 = vld [vmem:[%s3046_s2 + $0x18] sm:$0xff] (!%p279_p9)   ;;  %v2363_v17 = vld [vmem:[%s3046_s2 + $0x20] sm:$0xff] (!%p279_p9)   ;;  %v2367_v21 = vld [vmem:[%s3046_s2 + $0x28] sm:$0xff] (!%p279_p9)  }
  0x13   : > { %2019 = vmatpush3.bf16.msra.mxu0 (!%p279_p9), %v2351_v5  ;;  %v2360_v14 = vld [vmem:[%s3046_s2 + $0xd8] sm:$0xff] (!%p279_p9)   ;;  %v2364_v18 = vld [vmem:[%s3046_s2 + $0xe0] sm:$0xff] (!%p279_p9)   ;;  %v2368_v22 = vld [vmem:[%s3046_s2 + $0xe8] sm:$0xff] (!%p279_p9)  }
  0x14   : > { %2020 = vmatprep.subr.bf16.mxu0 (!%p279_p9), %v2354_v8  ;;  %v2361_v15 = vld [vmem:[%s3046_s2 + $0x98] sm:$0xff] (!%p279_p9)   ;;  %v2365_v19 = vld [vmem:[%s3046_s2 + $0xa0] sm:$0xff] (!%p279_p9)   ;;  %v2369_v23 = vld [vmem:[%s3046_s2 + $0xa8] sm:$0xff] (!%p279_p9)  }
  0x15   : > { %2059 = vmatpush3.bf16.msra.mxu1 %v2353_v7  ;;  %s3060_s19 = smov (!%p319_p10, %s1875_s19), 15  ;;  %v2370_v24 = vld [vmem:[%s3046_s2 + $0x70] sm:$0xff]   ;;  %v2374_v28 = vld [vmem:[%s3046_s2 + $0x78] sm:$0xff]   ;;  %v2381_v34 = vld [vmem:[%s3046_s2 + $0x140] sm:$0xff]  }
  0x16   : > { %2060 = vmatprep.subr.bf16.mxu1 %v2356_v10  ;;  %s2304_s17 = smul.u32 36, %s3060_s19  ;;  %v2371_v25 = vld [vmem:[%s3046_s2 + $0x30] sm:$0xff]   ;;  %v2375_v29 = vld [vmem:[%s3046_s2 + $0x38] sm:$0xff]   ;;  %v2385_v37 = vld [vmem:[%s3046_s2 + $0x100] sm:$0xff]   ;;  %s1878_s10 = sshll.u32 %s3060_s19, 2 }
  0x17   : > { %2021 = vmatpush3.bf16.msra.mxu0 %v2355_v9  ;;  %v2372_v26 = vld [vmem:[%s3046_s2 + $0xf0] sm:$0xff]   ;;  %v2376_v30 = vld [vmem:[%s3046_s2 + $0xf8] sm:$0xff]   ;;  %v2386_v38 = vld [vmem:[%s3046_s2 + $0x1c0] sm:$0xff]   ;;  %s2963_s20 = scalar_lea.vmem %s3045_s1, %s1878_s10  ;;  %s2015_s10 = sshll.u32 %s2619_s9, 10 }
  0x18   : > { %2022 = vmatprep.subr.bf16.mxu0 %v2358_v12  ;;  %v2373_v27 = vld [vmem:[%s3046_s2 + $0xb0] sm:$0xff]   ;;  %s2740_s13 = scalar_lea.vmem %s3044_s0, %s2304_s17  ;;  %v2380_v33 = vld [vmem:[%s3046_s2 + $0xb8] sm:$0xff]   ;;  %v2387_v39 = vld [vmem:[%s3046_s2 + $0x180] sm:$0xff]   ;;  %s315_s17 = sand.u32 1, %s2540_s28  }
  0x19   : > { %2061 = vmatpush3.bf16.msra.mxu1 %v2357_v11  ;;  %v2377_v31 = vld [vmem:[%s2740_s13] ss:$36 sps:$4 sm:$0xff]   ;;  %v2382_v35 = vld [vmem:[%s2740_s13 + $0x8] ss:$36 sps:$4 sm:$0xff]   ;;  %v2395_v46 = vld [vmem:[%s3046_s2 + $0x150] sm:$0xff]   ;;  %s1874_s25 = sshll.u32 %s315_s17, 6  ;;  %s2997_s19 = scalar_lea.hbm %s3052_s8, %s2015_s10 }
  0x1a   : > { %2062 = vmatprep.subr.bf16.mxu1 %v2360_v14  ;;  %v2379_v32 = vld [vmem:[%s2740_s13 + $0x4] ss:$36 sps:$4 sm:$0xff]   ;;  %v2384_v36 = vld [vmem:[%s2740_s13 + $0xc] ss:$36 sps:$4 sm:$0xff]   ;;  %v2396_v47 = vld [vmem:[%s2740_s13 + $0x54] ss:$36 sps:$4 sm:$0xff]  }
  0x1b   : > { %2023 = vmatpush3.bf16.msra.mxu0 %v2359_v13  ;;  %1172 = vmatprep.mubr.bf16.mxu0 %v2379_v32  ;;  %v2388_v40 = vld [vmem:[%s3046_s2 + $0x148] sm:$0xff]   ;;  %v2398_v48 = vld [vmem:[%s3046_s2 + $0x110] sm:$0xff]   ;;  %v2402_v52 = vld [vmem:[%s3046_s2 + $0x158] sm:$0xff]   ;;  %s317_s26 = scalar_lea.vmem [#allocation2], %s1874_s25  ;;  %s3003_s9 = scalar_lea.sflag [#allocation3], %s315_s17 }
  0x1c   : > { %2024 = vmatprep.subr.bf16.mxu0 %v2362_v16  ;;  %1237 = vmatprep.mubr.bf16.mxu1 %v2384_v36  ;;  %v2389_v41 = vld [vmem:[%s3046_s2 + $0x108] sm:$0xff]   ;;  %v2399_v49 = vld [vmem:[%s2740_s13 + $0x50] ss:$36 sps:$4 sm:$0xff]   ;;  %v2403_v53 = vld [vmem:[%s3046_s2 + $0x118] sm:$0xff]   ;;  %s1796_s12 = sshll.u32 %s317_s26, 4  ;;  %s2999_s12 = int_to_ptr.vmem [resolvable:$true] %s1796_s12 }
  0x1d   : > { %2063 = vmatpush3.bf16.msra.mxu1 %v2361_v15  ;;  %v2390_v42 = vld [vmem:[%s3046_s2 + $0x1c8] sm:$0xff]   ;;  %v2400_v50 = vld [vmem:[%s3046_s2 + $0x1d0] sm:$0xff]   ;;  %v2404_v54 = vld [vmem:[%s3046_s2 + $0x1d8] sm:$0xff]   ;;  %s2486_s21 = scalar_lea.vmem %s2999_s12, 1024 }
  0x1e   : > { %2064 = vmatprep.subr.bf16.mxu1 %v2364_v18  ;;  %v2391_v43 = vld [vmem:[%s2740_s13 + $0x4c] ss:$36 sps:$4 sm:$0xff]   ;;  %v2405_v55 = vld [vmem:[%s2740_s13 + $0x94] ss:$36 sps:$4 sm:$0xff]   ;;  %v2409_v58 = vld [vmem:[%s3046_s2 + $0x160] sm:$0xff]   ;;  %p2487_p11 = scmp.ne.s32.totalorder %s2999_s12, %s2486_s21 }
  0x1f   : > { %2025 = vmatpush3.bf16.msra.mxu0 %v2363_v17  ;;  %v2393_v44 = vld [vmem:[%s3046_s2 + $0x188] sm:$0xff]   ;;  %v2401_v51 = vld [vmem:[%s3046_s2 + $0x190] sm:$0xff]   ;;  %v2407_v56 = vld [vmem:[%s3046_s2 + $0x198] sm:$0xff]  }
  0x20   : > { %2026 = vmatprep.subr.bf16.mxu0 %v2366_v20  ;;  %v2394_v45 = vld [vmem:[%s2740_s13 + $0x48] ss:$36 sps:$4 sm:$0xff]   ;;  %v2408_v57 = vld [vmem:[%s2740_s13 + $0x90] ss:$36 sps:$4 sm:$0xff]   ;;  %v2410_v59 = vld [vmem:[%s2740_s13 + $0x9c] ss:$36 sps:$4 sm:$0xff]   ;;  %p2488_p12 = pnand %p2487_p11, %p2636_p5 }
  0x21   : > { %2065 = vmatpush3.bf16.msra.mxu1 %v2365_v19  ;;  %v2412_v60 = vld [vmem:[%s3046_s2 + $0x120] sm:$0xff]   ;;  %v2413_v61 = vld [vmem:[%s2740_s13 + $0x98] ss:$36 sps:$4 sm:$0xff]   ;;  %v2416_v0 = vld [vmem:[%s3046_s2 + $0x168] sm:$0xff]  }
  0x22   : > { %2066 = vmatprep.subr.bf16.mxu1 %v2368_v22  ;;  %v2414_v62 = vld [vmem:[%s3046_s2 + $0x1e0] sm:$0xff]   ;;  %v2417_v1 = vld [vmem:[%s3046_s2 + $0x128] sm:$0xff]   ;;  %v2422_v5 = vld [vmem:[%s2740_s13 + $0xd8] ss:$36 sps:$4 sm:$0xff]   ;;  %p2489_p13 = pneg %p2488_p12 }
  0x23   : > { %2027 = vmatpush3.bf16.msra.mxu0 %v2367_v21  ;;  %v2415_v63 = vld [vmem:[%s3046_s2 + $0x1a0] sm:$0xff]   ;;  %v2418_v2 = vld [vmem:[%s3046_s2 + $0x1e8] sm:$0xff]   ;;  %v2423_v6 = vld [vmem:[%s3046_s2 + $0x170] sm:$0xff]  }
  0x24   : > { %2028 = vmatprep.subr.bf16.mxu0 %v2370_v24  ;;  %v2419_v3 = vld [vmem:[%s2740_s13 + $0xdc] ss:$36 sps:$4 sm:$0xff]   ;;  %v2421_v4 = vld [vmem:[%s3046_s2 + $0x1a8] sm:$0xff]   ;;  %v2426_v8 = vld [vmem:[%s3046_s2 + $0x130] sm:$0xff]  }
  0x25   : > { %2067 = vmatpush3.bf16.msra.mxu1 %v2369_v23  ;;  %v2424_v7 = vld [vmem:[%s2740_s13 + $0xe4] ss:$36 sps:$4 sm:$0xff]   ;;  %v2428_v10 = vld [vmem:[%s3046_s2 + $0x1f0] sm:$0xff]   ;;  %v2430_v12 = vld [vmem:[%s3046_s2 + $0x178] sm:$0xff]  }
  0x26   : > { %2068 = vmatprep.subr.bf16.mxu1 %v2372_v26  ;;  %v2427_v9 = vld [vmem:[%s2740_s13 + $0xe0] ss:$36 sps:$4 sm:$0xff]   ;;  %v2429_v11 = vld [vmem:[%s3046_s2 + $0x1b0] sm:$0xff]   ;;  %v2431_v13 = vld [vmem:[%s3046_s2 + $0x138] sm:$0xff]  }
  0x27   : > { %2029 = vmatpush3.bf16.msra.mxu0 %v2371_v25  ;;  %v2432_v14 = vld [vmem:[%s3046_s2 + $0x1f8] sm:$0xff]   ;;  %v2433_v15 = vld [vmem:[%s2740_s13 + $0x10] ss:$36 sps:$4 sm:$0xff]   ;;  %v2437_v18 = vld [vmem:[%s3046_s2 + $0x200] sm:$0xff]  }
  0x28   : > { %2030 = vmatprep.subr.bf16.mxu0 %v2374_v28  ;;  %v2435_v16 = vld [vmem:[%s2740_s13 + $0x14] ss:$36 sps:$4 sm:$0xff]   ;;  %v2440_v20 = vld [vmem:[%s2740_s13 + $0x1c] ss:$36 sps:$4 sm:$0xff]   ;;  %v2441_v21 = vld [vmem:[%s3046_s2 + $0x208] sm:$0xff]  }
  0x29   : > { %2069 = vmatpush3.bf16.msra.mxu1 %v2373_v27  ;;  %v2436_v17 = vld [vmem:[%s3046_s2 + $0x1b8] sm:$0xff]   ;;  %v2445_v24 = vld [vmem:[%s3046_s2 + $0x210] sm:$0xff]   ;;  %v2446_v25 = vld [vmem:[%s2740_s13 + $0x64] ss:$36 sps:$4 sm:$0xff]  }
  0x2a   : > { %2070 = vmatprep.subr.bf16.mxu1 %v2376_v30  ;;  %v2438_v19 = vld [vmem:[%s2740_s13 + $0x18] ss:$36 sps:$4 sm:$0xff]   ;;  %v2450_v27 = vld [vmem:[%s2740_s13 + $0xa4] ss:$36 sps:$4 sm:$0xff]   ;;  %v2458_v32 = vld [vmem:[%s2740_s13 + $0xec] ss:$36 sps:$4 sm:$0xff]  }
  0x2b   : > { %2031 = vmatpush3.bf16.msra.mxu0 %v2375_v29  ;;  %v2442_v22 = vld [vmem:[%s2740_s13 + $0x5c] ss:$36 sps:$4 sm:$0xff]   ;;  %v2454_v29 = vld [vmem:[%s2740_s13 + $0xac] ss:$36 sps:$4 sm:$0xff]  }
  0x2c   : > { %2096 = vmatprep.subr.bf16.mxu0 %v2381_v34  ;;  %v2444_v23 = vld [vmem:[%s2740_s13 + $0x58] ss:$36 sps:$4 sm:$0xff]   ;;  %v2448_v28 = vld [vmem:[%s2740_s13 + $0x60] ss:$36 sps:$4 sm:$0xff]   ;;  %v2456_v34 = vld [vmem:[%s2740_s13 + $0xa8] ss:$36 sps:$4 sm:$0xff]  }
  0x2d   : > { %2071 = vmatpush3.bf16.msra.mxu1 %v2380_v33  ;;  %v2449_v26 = vld [vmem:[%s3046_s2 + $0x218] sm:$0xff]   ;;  %v2453_v30 = vld [vmem:[%s3046_s2 + $0x220] sm:$0xff]   ;;  %v2457_v33 = vld [vmem:[%s3046_s2 + $0x228] sm:$0xff]  }
  0x2e   : > { %1173 = vmatmul.mubr.bf16.vlgmr.msra.gmra.mrb[0].mxu0 %v2377_v31  ;;  %2136 = vmatprep.subr.bf16.mxu1 %v2386_v38  ;;  %v2452_v31 = vld [vmem:[%s2740_s13 + $0xa0] ss:$36 sps:$4 sm:$0xff]   ;;  %v2460_v36 = vld [vmem:[%s2740_s13 + $0xe8] ss:$36 sps:$4 sm:$0xff]  }
  0x2f   : > { %2097 = vmatpush3.bf16.msra.mxu0 %v2385_v37  ;;  %1180 = vmatprep.mubr.bf16.mxu0 %v2391_v43  ;;  %v2461_v37 = vld [vmem:[%s3046_s2 + $0x230] sm:$0xff]   ;;  %v2466_v38 = vld [vmem:[%s2740_s13 + $0x20] ss:$36 sps:$4 sm:$0xff]   ;;  %v2469_v43 = vld [vmem:[%s2740_s13 + $0xf8] ss:$36 sps:$4 sm:$0xff]  }
  0x30   : > { %1238 = vmatmul.mubr.bf16.vlgmr.msra.gmra.mrb[0].mxu1 %v2382_v35  ;;  %2098 = vmatprep.subr.bf16.mxu0 %v2388_v40  ;;  %v2462_v35 = vld [vmem:[%s2740_s13 + $0xf4] ss:$36 sps:$4 sm:$0xff]  }
  0x31   : > { %2137 = vmatpush3.bf16.msra.mxu1 %v2387_v39  ;;  %1245 = vmatprep.mubr.bf16.mxu1 %v2396_v47  ;;  %v2465_v39 = vld [vmem:[%s3046_s2 + $0x238] sm:$0xff]   ;;  %v2464_v40 = vld [vmem:[%s2740_s13 + $0xf0] ss:$36 sps:$4 sm:$0xff]  }
  0x32   : > { %2138 = vmatprep.subr.bf16.mxu1 %v2390_v42  ;;  %v2468_v42 = vld [vmem:[%s2740_s13 + $0xb0] ss:$36 sps:$4 sm:$0xff]   ;;  %v2473_v47 = vld [vmem:[%s3048_s4 + $0x18] sm:$0xff]  }
  0x33   : > { %2099 = vmatpush3.bf16.msra.mxu0 %v2389_v41  ;;  %v2467_v41 = vld [vmem:[%s2740_s13 + $0x68] ss:$36 sps:$4 sm:$0xff]   ;;  %s2490_s13 = sshll.u32 %s2550_s22, 4  ;;  %s2491_s13 = int_to_ptr.vmem [resolvable:$false] %s2490_s13 }
  0x34   : > { %2100 = vmatprep.subr.bf16.mxu0 %v2395_v46  ;;  %v2472_v46 = vld [vmem:[%s3048_s4 + $0x10] sm:$0xff]   ;;  %s2492_s23 = scalar_lea.vmem %s2491_s13, 2048  ;;  %p2493_p0 = scmp.lt.s32.totalorder %s2999_s12, %s2491_s13 }
  0x35   : > { %2139 = vmatpush3.bf16.msra.mxu1 %v2393_v44  ;;  %v2470_v44 = vld [vmem:[%s3048_s4] sm:$0xff]   ;;  %p2494_p1 = scmp.lt.s32.totalorder %s2492_s23, %s2486_s21 }
  0x36   : > { %1181 = vmatmul.mubr.bf16.gmra.mrb[4].mxu0 %v2394_v45  ;;  %2140 = vmatprep.subr.bf16.mxu1 %v2400_v50  ;;  %v2471_v45 = vld [vmem:[%s3048_s4 + $0x8] sm:$0xff]  }
  0x37   : > { %2101 = vmatpush3.bf16.msra.mxu0 %v2398_v48  ;;  %1188 = vmatprep.mubr.bf16.mxu0 %v2405_v55  ;;  %v2474_v48 = vld [vmem:[%s3048_s4 + $0x20] sm:$0xff]   ;;  %v2476_v50 = vld [vmem:[%s3048_s4 + $0x28] sm:$0xff]   ;;  %v2955_v55 = vld [vmem:[%s3050_s6 + $0x18] sm:$0xff]   ;;  %p2495_p2 = por %p2494_p1, %p2493_p0 }
  0x38   : > { %1246 = vmatmul.mubr.bf16.gmra.mrb[4].mxu1 %v2399_v49  ;;  %2102 = vmatprep.subr.bf16.mxu0 %v2402_v52  ;;  %v2925_v49 = vld [vmem:[%s3050_s6] sm:$0xff]   ;;  %v2478_v52 = vld [vmem:[%s3048_s4 + $0x30] sm:$0xff]  }
  0x39   : > { %2141 = vmatpush3.bf16.msra.mxu1 %v2401_v51  ;;  %1253 = vmatprep.mubr.bf16.mxu1 %v2410_v59  ;;  %v2935_v51 = vld [vmem:[%s3050_s6 + $0x8] sm:$0xff]   ;;  %v1879_v59 = vld [vmem:[%s3047_s3] ss:$0 sm:$0xff]  ;;  %p2496_p3 = pnand %p2495_p2, %p2489_p13 }
  0x3a   : > { %2142 = vmatprep.subr.bf16.mxu1 %v2404_v54  ;;  %v2480_v54 = vld [vmem:[%s3048_s4 + $0x38] sm:$0xff]  }
  0x3b   : > { %2103 = vmatpush3.bf16.msra.mxu0 %v2403_v53  ;;  %v2945_v53 = vld [vmem:[%s3050_s6 + $0x10] sm:$0xff]  }
  0x3c   : > { %2104 = vmatprep.subr.bf16.mxu0 %v2409_v58 }
  0x3d   : > { %2143 = vmatpush3.bf16.msra.mxu1 %v2407_v56  ;;  %v2482_v56 = vld [vmem:[%s2963_s20] sm:$0xff]  }
  0x3e   : > { %1189 = vmatmul.mubr.bf16.gmra.mrb[8].mxu0 %v2408_v57  ;;  %2144 = vmatprep.subr.bf16.mxu1 %v2414_v62  ;;  %v2483_v57 = vld [vmem:[%s2963_s20 + $0x8] sm:$0xff]  }
  0x3f   : > { %2105 = vmatpush3.bf16.msra.mxu0 %v2412_v60  ;;  %1196 = vmatprep.mubr.bf16.mxu0 %v2419_v3 }
  0x40   : > { %1254 = vmatmul.mubr.bf16.gmra.mrb[8].mxu1 %v2413_v61  ;;  %2106 = vmatprep.subr.bf16.mxu0 %v2416_v0 }
  0x41   : > { %2145 = vmatpush3.bf16.msra.mxu1 %v2415_v63  ;;  %1261 = vmatprep.mubr.bf16.mxu1 %v2424_v7 }
  0x42   : > { %2146 = vmatprep.subr.bf16.mxu1 %v2418_v2 }
  0x43   : > { %2107 = vmatpush3.bf16.msra.mxu0 %v2417_v1 }
  0x44   : > { %2108 = vmatprep.subr.bf16.mxu0 %v2423_v6 }
  0x45   : > { %2147 = vmatpush3.bf16.msra.mxu1 %v2421_v4 }
  0x46   : > { %1197 = vmatmul.mubr.bf16.gmra.mrb[12].mxu0 %v2422_v5  ;;  %2148 = vmatprep.subr.bf16.mxu1 %v2428_v10 }
  0x47   : > { %2109 = vmatpush3.bf16.msra.mxu0 %v2426_v8  ;;  %1302 = vmatprep.mubr.bf16.mxu0 %v2435_v16 }
  0x48   : > { %1262 = vmatmul.mubr.bf16.gmra.mrb[12].mxu1 %v2427_v9  ;;  %2110 = vmatprep.subr.bf16.mxu0 %v2430_v12 }
  0x49   : > { %2149 = vmatpush3.bf16.msra.mxu1 %v2429_v11  ;;  %1367 = vmatprep.mubr.bf16.mxu1 %v2440_v20 }
  0x4a   : > { %2150 = vmatprep.subr.bf16.mxu1 %v2432_v14 }
  0x4b   : > { %2111 = vmatpush3.bf16.msra.mxu0 %v2431_v13 }
  0x4c   : > { %2208 = vmatprep.subr.bf16.mxu0 %v2437_v18 }
  0x4d   : > { %2151 = vmatpush3.bf16.msra.mxu1 %v2436_v17 }
  0x4e   : > { %1303 = vmatmul.mubr.bf16.vlgmr.msra.gmra.mrb[16].mxu0 %v2433_v15  ;;  %2232 = vmatprep.subr.bf16.mxu1 %v2470_v44 }
  0x4f   : > { %2209 = vmatpush3.bf16.msra.mxu0 %v2437_v18  ;;  %1310 = vmatprep.mubr.bf16.mxu0 %v2442_v22 }
  0x50   : > { %1368 = vmatmul.mubr.bf16.vlgmr.msra.gmra.mrb[16].mxu1 %v2438_v19  ;;  %2210 = vmatprep.subr.bf16.mxu0 %v2441_v21 }
  0x51   : > { %1375 = vmatprep.mubr.bf16.mxu1 %v2446_v25  ;;  %2233 = vmatpush3.bf16.msra.mxu1 %v2470_v44 }
  0x52   : > { %2234 = vmatprep.subr.bf16.mxu1 %v2471_v45 }
  0x53   : > { %2211 = vmatpush3.bf16.msra.mxu0 %v2441_v21 }
  0x54   : > { %2212 = vmatprep.subr.bf16.mxu0 %v2445_v24 }
  0x55   : > { %2235 = vmatpush3.bf16.msra.mxu1 %v2471_v45 }
  0x56   : > { %1311 = vmatmul.mubr.bf16.gmra.mrb[20].mxu0 %v2444_v23  ;;  %2236 = vmatprep.subr.bf16.mxu1 %v2472_v46 }
  0x57   : > { %1318 = vmatprep.mubr.bf16.mxu0 %v2450_v27  ;;  %2213 = vmatpush3.bf16.msra.mxu0 %v2445_v24 }
  0x58   : > { %2214 = vmatprep.subr.bf16.mxu0 %v2449_v26  ;;  %1376 = vmatmul.mubr.bf16.gmra.mrb[20].mxu1 %v2448_v28 }
  0x59   : > { %1383 = vmatprep.mubr.bf16.mxu1 %v2454_v29  ;;  %2237 = vmatpush3.bf16.msra.mxu1 %v2472_v46 }
  0x5a   : > { %2238 = vmatprep.subr.bf16.mxu1 %v2473_v47 }
  0x5b   : > { %2215 = vmatpush3.bf16.msra.mxu0 %v2449_v26 }
  0x5c   : > { %2216 = vmatprep.subr.bf16.mxu0 %v2453_v30 }
  0x5d   : > { %2239 = vmatpush3.bf16.msra.mxu1 %v2473_v47 }
  0x5e   : > { %1319 = vmatmul.mubr.bf16.gmra.mrb[24].mxu0 %v2452_v31  ;;  %2240 = vmatprep.subr.bf16.mxu1 %v2474_v48 }
  0x5f   : > { %1326 = vmatprep.mubr.bf16.mxu0 %v2458_v32  ;;  %2217 = vmatpush3.bf16.msra.mxu0 %v2453_v30 }
  0x60   : > { %2218 = vmatprep.subr.bf16.mxu0 %v2457_v33  ;;  %1384 = vmatmul.mubr.bf16.gmra.mrb[24].mxu1 %v2456_v34 }
  0x61   : > { %1391 = vmatprep.mubr.bf16.mxu1 %v2462_v35  ;;  %2241 = vmatpush3.bf16.msra.mxu1 %v2474_v48 }
  0x62   : > { %2242 = vmatprep.subr.bf16.mxu1 %v2476_v50 }
  0x63   : > { %2219 = vmatpush3.bf16.msra.mxu0 %v2457_v33 }
  0x64   : > { %2220 = vmatprep.subr.bf16.mxu0 %v2461_v37 }
  0x65   : > { %2243 = vmatpush3.bf16.msra.mxu1 %v2476_v50 }
  0x66   : > { %1327 = vmatmul.mubr.bf16.gmra.mrb[28].mxu0 %v2460_v36  ;;  %2244 = vmatprep.subr.bf16.mxu1 %v2478_v52 }
  0x67   : > { %2224 = vmatprep.mubr.bf16.mxu0 %v2466_v38  ;;  %2221 = vmatpush3.bf16.msra.mxu0 %v2461_v37 }
  0x68   : > { %2222 = vmatprep.subr.bf16.mxu0 %v2465_v39  ;;  %1392 = vmatmul.mubr.bf16.gmra.mrb[28].mxu1 %v2464_v40 }
  0x69   : > { %2245 = vmatpush3.bf16.msra.mxu1 %v2478_v52 }
  0x6a   : > { %2246 = vmatprep.subr.bf16.mxu1 %v2480_v54 }
  0x6b   : > { %2223 = vmatpush3.bf16.msra.mxu0 %v2465_v39 }
  0x6c   : > { %2256 = vmatprep.subr.bf16.mxu0 %v2925_v49 }
  0x6d   : > { %2247 = vmatpush3.bf16.msra.mxu1 %v2480_v54 }
  0x6e   : > { %2225 = vmatmul.mubr.bf16.vlgmr.msra.gmra.mrb[32].mxu0 %v2467_v41  ;;  %2272 = vmatprep.subr.bf16.mxu1 %v2925_v49 }
  0x6f   : > { %2228 = vmatprep.mubr.bf16.mxu0 %v2468_v42  ;;  %2257 = vmatpush3.bf16.msra.mxu0 %v2925_v49 }
  0x70   : > { %2258 = vmatprep.subr.bf16.mxu0 %v2935_v51 }
  0x73   : > { %2259 = vmatpush3.bf16.msra.mxu0 %v2935_v51 }
  0x74   : > { %2260 = vmatprep.subr.bf16.mxu0 %v2945_v53 }
  0x76   : > { %2229 = vmatmul.mubr.bf16.gmra.mrb[36].mxu0 %v2469_v43 }
  0x77   : > { %2261 = vmatpush3.bf16.msra.mxu0 %v2945_v53  ;;  %2264 = vmatprep.mubr.msk.bf16.mxu0 %vm1680_vm0, %v2482_v56 }
  0x78   : > { %2262 = vmatprep.subr.bf16.mxu0 %v2955_v55 }
  0x7b   : > { %2263 = vmatpush3.bf16.msra.mxu0 %v2955_v55 }
  0x7e   : > { %2265 = vmatmul.mubr.msk.bf16.vlgmr.msra.gmra.mrb[40].mxu0 %vm1680_vm0, %v2483_v57 }
 0x101   : > { %v2032_v58 = vpop.f32.mrb[0].mxu0 }
 0x102   : > { %v2033_v60 = vpop.f32.mrb[1].mxu0 }
 0x103   : > { %v2034_v61 = vadd.f32 %v2033_v60, %v2032_v58  ;;  %v2035_v62 = vpop.f32.mrb[2].mxu0  ;;  %v2072_v63 = vpop.f32.mrb[0].mxu1 }
 0x104   : > { %v2036_v0 = vpop.f32.mrb[3].mxu0  ;;  %v2073_v3 = vpop.f32.mrb[1].mxu1 }
 0x105   : > { %v1175_v1 = vadd.f32 %v2034_v61, %v1879_v59  ;;  %v2037_v2 = vadd.f32 %v2036_v0, %v2035_v62  ;;  %v2074_v4 = vadd.f32 %v2073_v3, %v2072_v63  ;;  %v2075_v5 = vpop.f32.mrb[2].mxu1 }
 0x106   : > { %v2076_v7 = vpop.f32.mrb[3].mxu1 }
 0x107   : > { %v1178_v6 = vadd.f32 %v2037_v2, %v1879_v59  ;;  %v1240_v8 = vadd.f32 %v2074_v4, %v1175_v1  ;;  %v2077_v9 = vadd.f32 %v2076_v7, %v2075_v5 }
 0x109   : > { %v1243_v10 = vadd.f32 %v2077_v9, %v1178_v6  ;;  %v2038_v11 = vpop.f32.mrb[4].mxu0 }
 0x10a   : > { %v2039_v12 = vpop.f32.mrb[5].mxu0 }
 0x10b   : > { %v2040_v13 = vadd.f32 %v2039_v12, %v2038_v11  ;;  %v2041_v14 = vpop.f32.mrb[6].mxu0  ;;  %v2078_v17 = vpop.f32.mrb[4].mxu1 }
 0x10c   : > { %v2042_v15 = vpop.f32.mrb[7].mxu0  ;;  %v2079_v19 = vpop.f32.mrb[5].mxu1 }
 0x10d   : > { %v1183_v16 = vadd.f32 %v2040_v13, %v1879_v59  ;;  %v2043_v18 = vadd.f32 %v2042_v15, %v2041_v14  ;;  %v2080_v21 = vadd.f32 %v2079_v19, %v2078_v17  ;;  %v2081_v22 = vpop.f32.mrb[6].mxu1 }
 0x10e   : > { %v2082_v23 = vpop.f32.mrb[7].mxu1 }
 0x10f   : > { %v1186_v20 = vadd.f32 %v2043_v18, %v1879_v59  ;;  %v1248_v24 = vadd.f32 %v2080_v21, %v1183_v16  ;;  %v2083_v25 = vadd.f32 %v2082_v23, %v2081_v22 }
 0x111   : > { %v1251_v26 = vadd.f32 %v2083_v25, %v1186_v20  ;;  %v2044_v27 = vpop.f32.mrb[8].mxu0 }
 0x112   : > { %v2045_v28 = vpop.f32.mrb[9].mxu0 }
 0x113   : > { %v2046_v29 = vadd.f32 %v2045_v28, %v2044_v27  ;;  %v2047_v30 = vpop.f32.mrb[10].mxu0  ;;  %v2084_v31 = vpop.f32.mrb[8].mxu1 }
 0x114   : > { %v2048_v32 = vpop.f32.mrb[11].mxu0  ;;  %v2085_v35 = vpop.f32.mrb[9].mxu1 }
 0x115   : > { %v1191_v33 = vadd.f32 %v2046_v29, %v1879_v59  ;;  %v2049_v34 = vadd.f32 %v2048_v32, %v2047_v30  ;;  %v2086_v36 = vadd.f32 %v2085_v35, %v2084_v31  ;;  %v2087_v37 = vpop.f32.mrb[10].mxu1 }
 0x116   : > { %v2088_v39 = vpop.f32.mrb[11].mxu1 }
 0x117   : > { %v1194_v38 = vadd.f32 %v2049_v34, %v1879_v59  ;;  %v1256_v40 = vadd.f32 %v2086_v36, %v1191_v33  ;;  %v2089_v41 = vadd.f32 %v2088_v39, %v2087_v37 }
 0x119   : > { %v1259_v42 = vadd.f32 %v2089_v41, %v1194_v38  ;;  %v2050_v43 = vpop.f32.mrb[12].mxu0 }
 0x11a   : > { %v2051_v44 = vpop.f32.mrb[13].mxu0 }
 0x11b   : > { %v2052_v45 = vadd.f32 %v2051_v44, %v2050_v43  ;;  %v2053_v46 = vpop.f32.mrb[14].mxu0  ;;  %v2090_v47 = vpop.f32.mrb[12].mxu1 }
 0x11c   : > { %v2054_v48 = vpop.f32.mrb[15].mxu0  ;;  %v2091_v54 = vpop.f32.mrb[13].mxu1 }
 0x11d   : > { %v1199_v50 = vadd.f32 %v2052_v45, %v1879_v59  ;;  %v2055_v52 = vadd.f32 %v2054_v48, %v2053_v46  ;;  %v2092_v56 = vadd.f32 %v2091_v54, %v2090_v47  ;;  %v2093_v57 = vpop.f32.mrb[14].mxu1 }
 0x11e   : > { %v2094_v60 = vpop.f32.mrb[15].mxu1 }
 0x11f   : > { %v1202_v58 = vadd.f32 %v2055_v52, %v1879_v59  ;;  %v1264_v61 = vadd.f32 %v2092_v56, %v1199_v50  ;;  %v2095_v62 = vadd.f32 %v2094_v60, %v2093_v57 }
 0x121   : > { %v1267_v63 = vadd.f32 %v2095_v62, %v1202_v58  ;;  %v2112_v0 = vpop.f32.mrb[16].mxu0 }
 0x122   : > { %v2113_v1 = vpop.f32.mrb[17].mxu0 }
 0x123   : > { %v2114_v2 = vadd.f32 %v2113_v1, %v2112_v0  ;;  %v2115_v3 = vpop.f32.mrb[18].mxu0  ;;  %v2152_v6 = vpop.f32.mrb[16].mxu1 }
 0x124   : > { %v2116_v4 = vpop.f32.mrb[19].mxu0  ;;  %v2153_v9 = vpop.f32.mrb[17].mxu1 }
 0x125   : > { %v1305_v5 = vadd.f32 %v2114_v2, %v1240_v8  ;;  %v2117_v7 = vadd.f32 %v2116_v4, %v2115_v3  ;;  %v2154_v12 = vadd.f32 %v2153_v9, %v2152_v6  ;;  %v2155_v13 = vpop.f32.mrb[18].mxu1 }
 0x126   : > { %v2156_v14 = vpop.f32.mrb[19].mxu1 }
 0x127   : > { %v1308_v11 = vadd.f32 %v2117_v7, %v1243_v10  ;;  %v2157_v15 = vadd.f32 %v2156_v14, %v2155_v13  ;;  %v1370_v59 = vadd.f32 %v2154_v12, %v1305_v5 }
 0x129   : > { %v2118_v16 = vpop.f32.mrb[20].mxu0  ;;  %v1373_v20 = vadd.f32 %v2157_v15, %v1308_v11 }
 0x12a   : > { %v2119_v17 = vpop.f32.mrb[21].mxu0 }
 0x12b   : > { %v2120_v18 = vadd.f32 %v2119_v17, %v2118_v16  ;;  %v2121_v19 = vpop.f32.mrb[22].mxu0  ;;  %v2158_v23 = vpop.f32.mrb[20].mxu1 }
 0x12c   : > { %v2122_v21 = vpop.f32.mrb[23].mxu0  ;;  %v2159_v27 = vpop.f32.mrb[21].mxu1 }
 0x12d   : > { %v1313_v22 = vadd.f32 %v2120_v18, %v1248_v24  ;;  %v2123_v25 = vadd.f32 %v2122_v21, %v2121_v19  ;;  %v2160_v28 = vadd.f32 %v2159_v27, %v2158_v23  ;;  %v2161_v29 = vpop.f32.mrb[22].mxu1 }
 0x12e   : > { %v2162_v30 = vpop.f32.mrb[23].mxu1 }
 0x12f   : > { %v1316_v8 = vadd.f32 %v2123_v25, %v1251_v26  ;;  %v2163_v10 = vadd.f32 %v2162_v30, %v2161_v29  ;;  %v1378_v32 = vadd.f32 %v2160_v28, %v1313_v22 }
 0x131   : > { %v2124_v31 = vpop.f32.mrb[24].mxu0  ;;  %v1381_v36 = vadd.f32 %v2163_v10, %v1316_v8 }
 0x132   : > { %v2125_v33 = vpop.f32.mrb[25].mxu0 }
 0x133   : > { %v2126_v34 = vadd.f32 %v2125_v33, %v2124_v31  ;;  %v2127_v35 = vpop.f32.mrb[26].mxu0  ;;  %v2164_v39 = vpop.f32.mrb[24].mxu1  ;;  %v2484_v33 = vld [vmem:[%s2963_s20 + $0x10] sm:$0xff]  }
 0x134   : > { %v2128_v37 = vpop.f32.mrb[27].mxu0  ;;  %v2165_v43 = vpop.f32.mrb[25].mxu1 }
 0x135   : > { %v1321_v38 = vadd.f32 %v2126_v34, %v1256_v40  ;;  %v2129_v41 = vadd.f32 %v2128_v37, %v2127_v35  ;;  %v2166_v44 = vadd.f32 %v2165_v43, %v2164_v39  ;;  %v2167_v45 = vpop.f32.mrb[26].mxu1  ;;  %v1988_v37 = vld [vmem:[%s3049_s5] ss:$0 sm:$0xff] }
 0x136   : > { %v2168_v46 = vpop.f32.mrb[27].mxu1 }
 0x137   : > { %v1324_v24 = vadd.f32 %v2129_v41, %v1259_v42  ;;  %v2169_v26 = vadd.f32 %v2168_v46, %v2167_v45  ;;  %v1386_v48 = vadd.f32 %v2166_v44, %v1321_v38 }
 0x139   : > { %v2130_v47 = vpop.f32.mrb[28].mxu0  ;;  %v1389_v56 = vadd.f32 %v2169_v26, %v1324_v24 }
 0x13a   : > { %v2131_v50 = vpop.f32.mrb[29].mxu0 }
 0x13b   : > { %v2132_v52 = vadd.f32 %v2131_v50, %v2130_v47  ;;  %v2133_v54 = vpop.f32.mrb[30].mxu0  ;;  %v2170_v60 = vpop.f32.mrb[28].mxu1 }
 0x13c   : > { %v2134_v57 = vpop.f32.mrb[31].mxu0  ;;  %v2171_v0 = vpop.f32.mrb[29].mxu1 }
 0x13d   : > { %v1329_v58 = vadd.f32 %v2132_v52, %v1264_v61  ;;  %v2135_v62 = vadd.f32 %v2134_v57, %v2133_v54  ;;  %v2172_v1 = vadd.f32 %v2171_v0, %v2170_v60  ;;  %v2173_v2 = vpop.f32.mrb[30].mxu1 }
 0x13e   : > { %v2174_v3 = vpop.f32.mrb[31].mxu1 }
 0x13f   : > { %v1332_v40 = vadd.f32 %v2135_v62, %v1267_v63  ;;  %v2175_v42 = vadd.f32 %v2174_v3, %v2173_v2  ;;  %v1394_v4 = vadd.f32 %v2172_v1, %v1329_v58 }
 0x141   : > { %v2226_v5 = vpop.f32.mrb[32].mxu0  ;;  %v1397_v9 = vadd.f32 %v2175_v42, %v1332_v40 }
 0x142   : > { %v1443_v6 = vadd.f32 %v2226_v5, %v1378_v32  ;;  %v1434_v7 = vpop.f32.mrb[33].mxu0 }
 0x143   : > { %v1435_v11 = vadd.f32 %v1434_v7, %v1370_v59  ;;  %v2227_v12 = vpop.f32.mrb[34].mxu0 }
 0x144   : > { %v1446_v13 = vadd.f32 %v2227_v12, %v1381_v36  ;;  %v1437_v14 = vpop.f32.mrb[35].mxu0  ;;  %v1467_v16 = vmax.f32 %v1443_v6, 0.0 }
 0x145   : > { %v1438_v15 = vadd.f32 %v1437_v14, %v1373_v20  ;;  %v1465_v17 = vmax.f32 %v1435_v11, 0.0 }
 0x146   : > { %v1468_v61 = vmax.f32 %v1446_v13, 0.0 }
 0x147   : > { %v1466_v18 = vmax.f32 %v1438_v15, 0.0 }
 0x148   : > { %v1474_v19 = vpack.c.bf16 %v1468_v61, %v1467_v16 }
 0x149   : > { %v1473_v63 = vpack.c.bf16 %v1466_v18, %v1465_v17  ;;  %v2230_v21 = vpop.f32.mrb[36].mxu0 }
 0x14a   : > { %v1459_v22 = vadd.f32 %v2230_v21, %v1394_v4  ;;  %v1450_v23 = vpop.f32.mrb[37].mxu0 }
 0x14b   : > { %v1451_v25 = vadd.f32 %v1450_v23, %v1386_v48  ;;  %v2231_v27 = vpop.f32.mrb[38].mxu0  ;;  %2248 = vmatprep.mubr.bf16.mxu1 %v1473_v63 }
 0x14c   : > { %v1462_v8 = vadd.f32 %v2231_v27, %v1397_v9  ;;  %v1453_v28 = vpop.f32.mrb[39].mxu0  ;;  %2249 = vmatmul.mubr.bf16.vlgmr.msra.gmra.mrb[32].mxu1 %v1474_v19  ;;  %v1471_v20 = vmax.f32 %v1459_v22, 0.0 }
 0x14d   : > { %v1454_v59 = vadd.f32 %v1453_v28, %v1389_v56  ;;  %2276 = vmatpush3.bf16.msra.mxu1 %v2925_v49  ;;  %v1469_v30 = vmax.f32 %v1451_v25, 0.0  ;;  %v2485_v49 = vld [vmem:[%s2963_s20 + $0x18] sm:$0xff]  }
 0x14e   : > { %v1472_v29 = vmax.f32 %v1462_v8, 0.0  ;;  %2273 = vmatprep.subr.bf16.mxu1 %v2935_v51 }
 0x14f   : > { %v1470_v10 = vmax.f32 %v1454_v59, 0.0 }
 0x150   : > { %v1476_v31 = vpack.c.bf16 %v1472_v29, %v1471_v20 }
 0x151   : > { %v1475_v32 = vpack.c.bf16 %v1470_v10, %v1469_v30  ;;  %2277 = vmatpush3.bf16.msra.mxu1 %v2935_v51  ;;  %v2266_v34 = vpop.f32.mrb[40].mxu0 }
 0x152   : > { %2274 = vmatprep.subr.bf16.mxu1 %v2945_v53  ;;  %v1727_v51 = vpop.f32.mrb[41].mxu0 }
 0x153   : > { %2252 = vmatprep.mubr.bf16.mxu1 %v1475_v32  ;;  %v2267_v35 = vpop.f32.mrb[42].mxu0 }
 0x154   : > { %2253 = vmatmul.mubr.bf16.gmra.mrb[36].mxu1 %v1476_v31  ;;  %v1730_v36 = vpop.f32.mrb[43].mxu0 }
 0x155   : > { %2278 = vmatpush3.bf16.msra.mxu1 %v2945_v53  ;;  %2268 = vmatprep.mubr.msk.bf16.mxu1 %vm1680_vm0, %v2484_v33 }
 0x156   : > { %2275 = vmatprep.subr.bf16.mxu1 %v2955_v55 }
 0x159   : > { %2279 = vmatpush3.bf16.msra.mxu1 %v2955_v55  ;;  %v1997_v55 = vld [vmem:[%s3051_s7] ss:$0 sm:$0xff] }
 0x15a   : > { %v2294_v0 = vadd.f32 %v1997_v55, %v1988_v37 }
 0x160   : > { %2269 = vmatmul.mubr.msk.bf16.vlgmr.msra.gmra.mrb[36].mxu1 %vm1680_vm0, %v2485_v49 }
 0x21f   : > { %v2250_v38 = vpop.f32.mrb[32].mxu1 }
 0x220   : > { %v1591_v53 = vadd.f32 %v2250_v38, %v1988_v37  ;;  %v1582_v39 = vpop.f32.mrb[33].mxu1 }
 0x221   : > { %v1583_v41 = vadd.f32 %v1988_v37, %v1582_v39  ;;  %v2251_v43 = vpop.f32.mrb[34].mxu1 }
 0x222   : > { %v1594_v24 = vadd.f32 %v2251_v43, %v1988_v37  ;;  %v2281_v44 = vadd.f32 %v2266_v34, %v1591_v53  ;;  %v1585_v45 = vpop.f32.mrb[35].mxu1 }
 0x223   : > { %v1586_v46 = vadd.f32 %v1988_v37, %v1585_v45  ;;  %v2284_v26 = vadd.f32 %v1727_v51, %v1583_v41 }
 0x224   : > { %v2282_v47 = vadd.f32 %v2281_v44, %v1997_v55  ;;  %v2287_v48 = vadd.f32 %v1997_v55, %v1594_v24 }
 0x225   : > { %v2285_v50 = vadd.f32 %v2284_v26, %v1997_v55  ;;  %v2290_v52 = vadd.f32 %v1997_v55, %v1586_v46 }
 0x226   : > { %v1768_v54 = vmax.f32 %v2282_v47, 0.0  ;;  %v2288_v56 = vadd.f32 %v2287_v48, %v2267_v35 }
 0x227   : > { %v1766_v57 = vmax.f32 %v2285_v50, 0.0  ;;  %v2291_v58 = vadd.f32 %v2290_v52, %v1730_v36 }
 0x228   : > { %1776 = vst [vmem:[%s317_s26 + $0x10] sm:$0xff] %v1768_v54  ;;  %v1769_v60 = vmax.f32 %v2288_v56, 0.0 }
 0x229   : > { %1774 = vst [vmem:[%s317_s26] sm:$0xff] %v1766_v57  ;;  %v1767_v62 = vmax.f32 %v2291_v58, 0.0 }
 0x22a   : > { %1777 = vst [vmem:[%s317_s26 + $0x18] sm:$0xff] %v1769_v60 }
 0x22b   : > { %1775 = vst [vmem:[%s317_s26 + $0x8] sm:$0xff] %v1767_v62 }
 0x233   : > { %v2270_v40 = vpop.f32.mrb[36].mxu1 }
 0x234   : > { %v2293_v1 = vadd.f32 %v2294_v0, %v2270_v40  ;;  %v1743_v2 = vpop.f32.mrb[37].mxu1 }
 0x235   : > { %v2295_v3 = vadd.f32 %v2294_v0, %v1743_v2  ;;  %v2271_v42 = vpop.f32.mrb[38].mxu1 }
 0x236   : > { %v1772_v4 = vmax.f32 %v2293_v1, 0.0  ;;  %v2297_v5 = vadd.f32 %v2294_v0, %v2271_v42  ;;  %v1746_v6 = vpop.f32.mrb[39].mxu1 }
 0x237   : > { %v1770_v7 = vmax.f32 %v2295_v3, 0.0  ;;  %v2299_v9 = vadd.f32 %v2294_v0, %v1746_v6 }
 0x238   : > { %1780 = vst [vmem:[%s317_s26 + $0x30] sm:$0xff] %v1772_v4  ;;  %v1773_v11 = vmax.f32 %v2297_v5, 0.0 }
 0x239   : > { %1778 = vst [vmem:[%s317_s26 + $0x20] sm:$0xff] %v1770_v7  ;;  %v1771_v12 = vmax.f32 %v2299_v9, 0.0 }
 0x23a   : > { %1781 = vst [vmem:[%s317_s26 + $0x38] sm:$0xff] %v1773_v11 }
 0x23b   : > { %1779 = vst [vmem:[%s317_s26 + $0x28] sm:$0xff] %v1771_v12 }
 0x23c   : > { %2499 = shalt.err (!%p2496_p3)
}
 0x23d   : > { %s2500_s17 = scalar_lea.hbm %s2997_s19, 1024  ;;  %s2504_s26 = scalar_lea.hbm %s3052_s8, 2048 }
 0x23e   : > { %p2501_p4 = scmp.ne.s32.totalorder %s2997_s19, %s2500_s17  ;;  %p2505_p9 = scmp.lt.u32.totalorder %s2997_s19, %s3052_s8 }
 0x23f   : > { %p2506_p10 = scmp.lt.u32.totalorder %s2504_s26, %s2500_s17  ;;  %p2508_p12 = scmp.lt.u32.totalorder %s2500_s17, %s2997_s19 }
 0x240   : > { %p2502_p7 = pnand %p2501_p4, %p2636_p5 }
 0x241   : > { %p2507_p11 = por %p2506_p10, %p2505_p9 }
 0x242   : > { %p2503_p8 = pneg %p2502_p7 }
 0x243   : > { %p2509_p13 = por %p2508_p12, %p2507_p11 }
 0x245   : > { %p2510_p0 = pnand %p2509_p13, %p2503_p8 }
 0x247   : > { %2513 = shalt.err (!%p2510_p0)
}
 0x248   : > { %s2551_s20 = smov 128   ;;  %s2552_s21 = smov 8  }
 0x249   : > { %2305 = dma.vmem_to_hbm [thread:$0]  (%p2636_p5), %s2999_s12, 1024, %s2997_s19, %s3003_s9, %s2551_s20, %s2551_s20, %s2552_s21  }
 0x24a PF: > { %p2311_p1 = scmp.ge.s32.totalorder %s2548_s30, 2  ;;  %s1811_s22 = sand.u32 1, %s2536_s27  }
 0x24b   : > { %s1812_s13 = scalar_lea.sflag [#allocation3], %s1811_s22 }
 0x24c   : > { %p2308_p2 = pnand %p2311_p1, %p2640_p6 }
 0x24e   : > { %2531 = dma.done.wait (!%p2308_p2), %s1812_s13, 1024  }
 0x24f   : > { %2533 = vsyncadd (!%p2308_p2), %s1812_s13, 4294966272  ;;  %p18_p3 = scmp.ge.s32.totalorder %s2623_s11, 4   ;;  %s3055_s27 = smov %s2540_s28 }
 0x250   : > { %s3056_s28 = smov %s2544_s29  ;;  %s3057_s29 = smov %s2634_s14 }
 0x251   : > { %s3058_s30 = smov %s2623_s11  ;;  %20 = sbr.rel (!%p18_p3) target bundleno = 3 (0x3), region = 90 }
 0x258   :  { %1817 = vsyncpa [#allocation3], 1 }
 0x259   :  { %1819 = vsyncpa [#allocation3 + $0x1], 1 }

</bundles_post_ra>
